<compile_context>
chip_gen: v7x
topology: tpu7x:2x2x1
jax: 0.10.0
libtpu: 0.0.40
codegen_flags: <defaults>
</compile_context>

<pallas_src>
import functools

import jax
import jax.numpy as jnp
from jax import lax
from jax.experimental import pallas as pl
from jax.experimental.pallas import tpu as pltpu


def _round_up(n, m):
    return -(-n // m) * m


# ------------------------------ Pallas kernel --------------------------------
def temporal_block_kernel(x_ref, halo_ref, w1_ref, b1_ref, w2_ref, b2_ref,
                          wd_ref, bd_ref, o_ref, xwin_ref, h1_ref, *,
                          K, DIL, P, T, HPAD, C_IN, C_OUT, C_IN_PAD, C_OUT_PAD,
                          HAS_DS, FUSE1, FUSE2):
    # x_ref   : (1, C_IN, T)          f32/bf16   current time tile of x
    # halo_ref: (1, C_IN, HPAD)       f32/bf16   x[:, j*T-HPAD : j*T] (only last 2P used)
    # w1_ref  : (C_OUT, K*C_IN_PAD)   bf16 fused   or (K, C_OUT, C_IN_PAD) per-tap
    # w2_ref  : (C_OUT, K*C_OUT_PAD)  bf16 fused   or (K, C_OUT, C_OUT_PAD) per-tap
    # wd_ref  : (C_OUT, C_IN) bf16    1x1 downsample (unused if HAS_DS=False)
    # b*_ref  : (C_OUT, 1) f32
    # o_ref   : (1, C_OUT, T)
    # xwin_ref: (C_IN_PAD, HPAD+T)    bf16 scratch: lane-aligned causal x window
    # h1_ref  : (C_OUT_PAD, T+P)      bf16 scratch: conv1 output staging
    j = pl.program_id(1)
    HH = T + P

    x_cur = x_ref[0]                                  # (C_IN, T), input dtype
    x_bf = x_cur.astype(jnp.bfloat16)                 # in-kernel cast (no extra HBM pass)

    # ---- assemble the causal window: xwin[:, HPAD + i] = x[:, j*T + i] -------
    @pl.when(j == 0)
    def _():                                          # causal zero padding for tile 0
        xwin_ref[0:C_IN, 0:HPAD] = jnp.zeros((C_IN, HPAD), jnp.bfloat16)

    @pl.when(j > 0)
    def _():
        xwin_ref[0:C_IN, 0:HPAD] = halo_ref[0].astype(jnp.bfloat16)

    xwin_ref[0:C_IN, HPAD:] = x_bf                    # 128-aligned, unmasked stores
    if C_IN_PAD > C_IN:                               # zero pad rows (aligned im2col slabs)
        xwin_ref[C_IN:, :] = jnp.zeros((C_IN_PAD - C_IN, HPAD + T), jnp.bfloat16)

    base = HPAD - 2 * P                               # first column any tap ever reads

    # ---- conv1 (dilated, causal) + chomp + bias + relu -----------------------
    if FUSE1:
        rhs1 = jnp.concatenate(
            [xwin_ref[:, base + k * DIL: base + k * DIL + HH] for k in range(K)], axis=0)
        acc1 = jnp.dot(w1_ref[...], rhs1, preferred_element_type=jnp.float32)
    else:
        acc1 = jnp.dot(w1_ref[0], xwin_ref[:, base: base + HH],
                       preferred_element_type=jnp.float32)
        for k in range(1, K):
            acc1 = acc1 + jnp.dot(w1_ref[k],
                                  xwin_ref[:, base + k * DIL: base + k * DIL + HH],
                                  preferred_element_type=jnp.float32)
    h1 = jnp.maximum(acc1 + b1_ref[...], 0.0)         # (C_OUT, HH) f32
    # TODO(synk): dropout1 is inference-mode identity.

    # stage h1 (bf16) in VMEM for conv2's shifted reads
    h1_ref[0:C_OUT, :] = h1.astype(jnp.bfloat16)
    if C_OUT_PAD > C_OUT:
        h1_ref[C_OUT:, :] = jnp.zeros((C_OUT_PAD - C_OUT, HH), jnp.bfloat16)

    # conv2's causal left padding must be exact zeros; only tile 0 pays the fix.
    @pl.when(j == 0)
    def _():
        h1_ref[0:C_OUT, 0:P] = jnp.zeros((C_OUT, P), jnp.bfloat16)

    # ---- conv2 (dilated, causal) + chomp + bias + relu -----------------------
    if FUSE2:
        rhs2 = jnp.concatenate(
            [h1_ref[:, k * DIL: k * DIL + T] for k in range(K)], axis=0)
        acc2 = jnp.dot(w2_ref[...], rhs2, preferred_element_type=jnp.float32)
    else:
        acc2 = jnp.dot(w2_ref[0], h1_ref[:, 0:T], preferred_element_type=jnp.float32)
        for k in range(1, K):
            acc2 = acc2 + jnp.dot(w2_ref[k], h1_ref[:, k * DIL: k * DIL + T],
                                  preferred_element_type=jnp.float32)
    h2 = jnp.maximum(acc2 + b2_ref[...], 0.0)         # (C_OUT, T) f32
    # TODO(synk): dropout2 is inference-mode identity.

    # ---- residual path -------------------------------------------------------
    if HAS_DS:
        res = jnp.dot(wd_ref[...], x_bf, preferred_element_type=jnp.float32) + bd_ref[...]
    else:
        res = x_cur.astype(jnp.float32)               # identity residual kept in f32

    o_ref[0] = jnp.maximum(h2 + res, 0.0).astype(o_ref.dtype)


# --------------------------------- wrapper ------------------------------------
def _vmem_limit_bytes():
    # ~48 MiB on v7x (64 MiB VMEM), ~96 MiB on v5e/v6e (128 MiB VMEM).
    cap = 64 * 1024 * 1024                            # conservative fallback
    try:
        cap = int(getattr(pltpu.get_tpu_info(), "vmem_capacity_bytes", cap))
    except Exception:
        pass
    return min(cap * 3 // 4, 100 * 1024 * 1024)


def _tile_vmem_bytes(t, *, c_in, c_out, c_in_pad, c_out_pad, p, hpad, k,
                     x_bytes, out_bytes):
    """Rough per-tile VMEM footprint (double-buffered IO + scratch + live values)."""
    hh = t + p
    dma = 2 * c_in * (t + hpad) * x_bytes + 2 * c_out * t * out_bytes
    scratch = c_in_pad * (hpad + t) * 2 + c_out_pad * hh * 2
    weights = 2 * (k * c_out * (c_in_pad + c_out_pad) + c_out * c_in) + 3 * c_out * 4
    live = 4 * c_out * hh * 4 + k * max(c_in_pad, c_out_pad) * hh * 2
    return dma + scratch + weights + live


def _choose_time_tile(L, l_tile, *, hpad, budget, est):
    """Largest lane-dense (multiple of hpad) divisor of L that is <= l_tile and fits VMEM."""
    best = None
    t_max = min(L, max(l_tile, 128))
    t = 128
    while t <= t_max:
        if L % t == 0 and t % hpad == 0 and est(t) <= budget:
            best = t
        t += 128
    return best if best is not None else L            # single-tile fallback


def _prep_conv_weight(w, c_pad, fuse):
    """PyTorch (C_out, C_in, K) -> bf16 MXU layout (taps fused or per-tap)."""
    c_out, c_in, k = w.shape
    wt = jnp.transpose(w, (2, 0, 1))                   # (K, C_out, C_in)
    if c_pad > c_in:
        wt = jnp.pad(wt, ((0, 0), (0, 0), (0, c_pad - c_in)))
    if fuse:                                           # (C_out, K*c_pad); col k*c_pad+c = w[:, c, k]
        wt = jnp.transpose(wt, (1, 0, 2)).reshape(c_out, k * c_pad)
    return wt.astype(jnp.bfloat16)


def temporal_block(x, params, *, kernel_size, dilation, l_tile=512,
                   out_dtype=jnp.float32, mxu_contraction=256):
    """x: (B, C_in, L) -> (B, C_out, L).  TemporalBlock.forward (eval mode).

    l_tile: upper bound on the lane-dense time tile; sweep 512-2048 on v5e/v6e,
            the VMEM-budget chooser keeps v7x (64 MiB) within limits.
    out_dtype: use jnp.bfloat16 when this block feeds another block to halve the
            output HBM stream; f32 by default to match the PyTorch module.
    mxu_contraction: 256 on v6e/v7x, 128 on v5e (tap-fusion threshold).
    """
    B, C_in, L = x.shape
    w1, b1, w2, b2, wd, bd = params                    # PyTorch layouts
    C_out = w1.shape[0]
    K, DIL = kernel_size, dilation
    P = (K - 1) * DIL                                  # == padding == chomp size
    assert P >= 1, "kernel assumes a causal receptive field (K > 1)"
    HPAD = max(128, _round_up(2 * P, 128))             # lane-aligned halo width

    has_ds = wd is not None
    if not has_ds:
        assert C_in == C_out, "identity residual requires n_inputs == n_outputs"
        wd = jnp.zeros((C_out, C_in), jnp.float32)
        bd = jnp.zeros((C_out,), jnp.float32)

    C_in_pad = _round_up(C_in, 16)                     # bf16 sublane packing
    C_out_pad = _round_up(C_out, 16)
    fuse1 = C_in_pad < mxu_contraction                 # fuse taps when per-tap contraction
    fuse2 = C_out_pad < mxu_contraction                # under-fills the MXU

    vmem_limit = _vmem_limit_bytes()
    est = functools.partial(_tile_vmem_bytes, c_in=C_in, c_out=C_out,
                            c_in_pad=C_in_pad, c_out_pad=C_out_pad, p=P, hpad=HPAD,
                            k=K, x_bytes=x.dtype.itemsize,
                            out_bytes=jnp.dtype(out_dtype).itemsize)
    T = _choose_time_tile(L, l_tile, hpad=HPAD,
                          budget=max(vmem_limit // 2, 4 << 20), est=est)
    NT = L // T

    # one-time tiny weight/bias re-layout
    w1p = _prep_conv_weight(w1, C_in_pad, fuse1)
    w2p = _prep_conv_weight(w2, C_out_pad, fuse2)
    wdp = wd.astype(jnp.bfloat16)
    b1c = b1.reshape(C_out, 1).astype(jnp.float32)
    b2c = b2.reshape(C_out, 1).astype(jnp.float32)
    bdc = bd.reshape(C_out, 1).astype(jnp.float32)

    # Causal halo = second, 128-lane BlockSpec view straight into x (no side
    # array / extra HBM pass).  Tile 0's block index is clamped; the kernel
    # overwrites the halo region with zeros for j == 0.
    if NT > 1:
        ratio = T // HPAD                              # exact: chooser enforces T % HPAD == 0
        halo_arg = x
        halo_map = lambda b, j: (b, 0, jnp.maximum(j * ratio - 1, 0))
    else:
        halo_arg = jnp.zeros((B, C_in, HPAD), x.dtype)
        halo_map = lambda b, j: (b, 0, 0)

    kern = functools.partial(
        temporal_block_kernel, K=K, DIL=DIL, P=P, T=T, HPAD=HPAD,
        C_IN=C_in, C_OUT=C_out, C_IN_PAD=C_in_pad, C_OUT_PAD=C_out_pad,
        HAS_DS=has_ds, FUSE1=fuse1, FUSE2=fuse2)

    def _call(single_buffer_consts):
        def const_spec(a):
            nd = a.ndim
            idx = lambda *_: (0,) * nd
            if single_buffer_consts:                   # constant operands: fetch once, 1 buffer
                return pl.BlockSpec(a.shape, idx, pipeline_mode=pl.Buffered(1))
            return pl.BlockSpec(a.shape, idx)

        return pl.pallas_call(
            kern,
            out_shape=jax.ShapeDtypeStruct((B, C_out, L), out_dtype),
            grid_spec=pltpu.PrefetchScalarGridSpec(
                num_scalar_prefetch=0,
                grid=(B, NT),
                in_specs=[
                    pl.BlockSpec((1, C_in, T), lambda b, j: (b, 0, j)),
                    pl.BlockSpec((1, C_in, HPAD), halo_map),
                    const_spec(w1p), const_spec(b1c),
                    const_spec(w2p), const_spec(b2c),
                    const_spec(wdp), const_spec(bdc),
                ],
                out_specs=pl.BlockSpec((1, C_out, T), lambda b, j: (b, 0, j)),
                scratch_shapes=[
                    pltpu.VMEM((C_in_pad, HPAD + T), jnp.bfloat16),
                    pltpu.VMEM((C_out_pad, T + P), jnp.bfloat16),
                ],
            ),
            compiler_params=pltpu.CompilerParams(
                dimension_semantics=("parallel", "parallel"),
                vmem_limit_bytes=vmem_limit),
        )(x, halo_arg, w1p, b1c, w2p, b2c, wdp, bdc)

    try:
        return _call(True)
    except Exception:
        # pipeline_mode=pl.Buffered(1) unsupported on this jax -> default buffering.
        return _call(False)


# ----------------------------- pure-JAX reference ------------------------------
def temporal_block_ref(x, params, *, kernel_size, dilation):
    """TemporalBlock.forward (eval), emulating the kernel's bf16 MXU operands."""
    w1, b1, w2, b2, wd, bd = params
    P = (kernel_size - 1) * dilation
    dn = ("NCH", "OIH", "NCH")
    rnd = lambda a: a.astype(jnp.bfloat16).astype(jnp.float32)

    def conv(inp, w, b):
        y = lax.conv_general_dilated(rnd(inp), rnd(w), window_strides=(1,),
                                     padding=[(P, P)], rhs_dilation=(dilation,),
                                     dimension_numbers=dn)
        return y + b[None, :, None]

    out = jnp.maximum(conv(x, w1, b1)[:, :, :-P], 0.0)          # conv1+chomp+relu
    out = jnp.maximum(conv(out, w2, b2)[:, :, :-P], 0.0)        # conv2+chomp+relu
    if wd is None:
        res = x
    else:
        res = lax.conv_general_dilated(rnd(x), rnd(wd)[:, :, None], window_strides=(1,),
                                       padding=[(0, 0)], dimension_numbers=dn)
        res = res + bd[None, :, None]
    return jnp.maximum(out + res, 0.0)


# ------------------------------------ main -------------------------------------
if __name__ == "__main__":
    def run_case(key, *, B, C_IN, C_OUT, L, KSIZE, DIL, has_downsample):
        kx, k1, k2, kd, kb1, kb2, kbd = jax.random.split(key, 7)
        x = jax.random.normal(kx, (B, C_IN, L), jnp.float32)
        # matches the module's normal_(0, 0.01) weight init; small random biases
        w1 = 0.01 * jax.random.normal(k1, (C_OUT, C_IN, KSIZE), jnp.float32)
        w2 = 0.01 * jax.random.normal(k2, (C_OUT, C_OUT, KSIZE), jnp.float32)
        b1 = 0.05 * jax.random.normal(kb1, (C_OUT,), jnp.float32)
        b2 = 0.05 * jax.random.normal(kb2, (C_OUT,), jnp.float32)
        if has_downsample:
            wd = 0.01 * jax.random.normal(kd, (C_OUT, C_IN), jnp.float32)
            bd = 0.05 * jax.random.normal(kbd, (C_OUT,), jnp.float32)
        else:
            wd, bd = None, None
        params = (w1, b1, w2, b2, wd, bd)

        out = jax.block_until_ready(
            temporal_block(x, params, kernel_size=KSIZE, dilation=DIL))
        assert out.shape == (B, C_OUT, L)

        ref = temporal_block_ref(x, params, kernel_size=KSIZE, dilation=DIL)
        max_err = float(jnp.max(jnp.abs(out - ref)))
        assert jnp.allclose(out, ref, atol=2e-3, rtol=2e-2), (
            f"mismatch vs reference: max abs err = {max_err}")

    key0 = jax.random.PRNGKey(0)
    k_a, k_b = jax.random.split(key0)
    # multi-tile path (T=512, 2 time tiles): downsample residual + causal halo view
    run_case(k_a, B=2, C_IN=4, C_OUT=8, L=1024, KSIZE=3, DIL=2, has_downsample=True)
    # single-tile path: identity residual (n_inputs == n_outputs), zero halo
    run_case(k_b, B=2, C_IN=8, C_OUT=8, L=256, KSIZE=3, DIL=4, has_downsample=False)
    print("KERNEL_OK")
</pallas_src>

<mosaic_0001>
module attributes {stable_mosaic.version = 11 : i64} {
  func.func @temporal_block_kernel(%arg0: i32, %arg1: i32, %arg2: memref<1x4x512xf32, #tpu.memory_space<vmem>>, %arg3: memref<1x4x128xf32, #tpu.memory_space<vmem>>, %arg4: memref<8x48xbf16, #tpu.memory_space<vmem>>, %arg5: memref<8x1xf32, #tpu.memory_space<vmem>>, %arg6: memref<8x48xbf16, #tpu.memory_space<vmem>>, %arg7: memref<8x1xf32, #tpu.memory_space<vmem>>, %arg8: memref<8x4xbf16, #tpu.memory_space<vmem>>, %arg9: memref<8x1xf32, #tpu.memory_space<vmem>>, %arg10: memref<1x8x512xf32, #tpu.memory_space<vmem>>, %arg11: memref<16x640xbf16, #tpu.memory_space<vmem>>, %arg12: memref<16x516xbf16, #tpu.memory_space<vmem>>) attributes {dimension_semantics = [#tpu.dimension_semantics<parallel>, #tpu.dimension_semantics<parallel>], iteration_bounds = array<i64: 2, 2>, scalar_prefetch = 0 : i64, scratch_operands = 2 : i64, tpu.core_type = #tpu.core_type<tc>, window_params = [{transform_indices = @transform_0, window_bounds = array<i64: 1, 4, 512>}, {transform_indices = @transform_1, window_bounds = array<i64: 1, 4, 128>}, {pipeline_mode = #tpu.pipeline_mode<synchronous>, transform_indices = @transform_2, window_bounds = array<i64: 8, 48>}, {pipeline_mode = #tpu.pipeline_mode<synchronous>, transform_indices = @transform_3, window_bounds = array<i64: 8, 1>}, {pipeline_mode = #tpu.pipeline_mode<synchronous>, transform_indices = @transform_4, window_bounds = array<i64: 8, 48>}, {pipeline_mode = #tpu.pipeline_mode<synchronous>, transform_indices = @transform_5, window_bounds = array<i64: 8, 1>}, {pipeline_mode = #tpu.pipeline_mode<synchronous>, transform_indices = @transform_6, window_bounds = array<i64: 8, 4>}, {pipeline_mode = #tpu.pipeline_mode<synchronous>, transform_indices = @transform_7, window_bounds = array<i64: 8, 1>}, {transform_indices = @transform_8, window_bounds = array<i64: 1, 8, 512>}]} {
    %c0 = arith.constant 0 : index
    %c0_0 = arith.constant 0 : index
    %c0_1 = arith.constant 0 : index
    %0 = vector.load %arg2[%c0, %c0_0, %c0_1] : memref<1x4x512xf32, #tpu.memory_space<vmem>>, vector<1x4x512xf32>
    %1 = vector.shape_cast %0 : vector<1x4x512xf32> to vector<4x512xf32>
    %2 = arith.truncf %1 : vector<4x512xf32> to vector<4x512xbf16>
    %c0_i32 = arith.constant 0 : i32
    %3 = arith.cmpi eq, %arg1, %c0_i32 : i32
    %4 = arith.extui %3 : i1 to i32
    %c0_i32_2 = arith.constant 0 : i32
    %5 = arith.cmpi ne, %4, %c0_i32_2 : i32
    scf.if %5 {
      %cst_42 = arith.constant 0.000000e+00 : bf16
      %52 = vector.broadcast %cst_42 : bf16 to vector<4x128xbf16>
      %c0_43 = arith.constant 0 : index
      %c0_44 = arith.constant 0 : index
      %53 = vector.load %arg11[%c0_43, %c0_44] : memref<16x640xbf16, #tpu.memory_space<vmem>>, vector<4x128xbf16>
      tpu.vector_store %arg11[%c0_43, %c0_44], %52 {strides = array<i32>} : memref<16x640xbf16, #tpu.memory_space<vmem>>, vector<4x128xbf16>,
    } else {
    }
    %c0_i32_3 = arith.constant 0 : i32
    %6 = arith.cmpi sgt, %arg1, %c0_i32_3 : i32
    %7 = arith.extui %6 : i1 to i32
    %c0_i32_4 = arith.constant 0 : i32
    %8 = arith.cmpi ne, %7, %c0_i32_4 : i32
    scf.if %8 {
      %c0_42 = arith.constant 0 : index
      %c0_43 = arith.constant 0 : index
      %c0_44 = arith.constant 0 : index
      %52 = vector.load %arg3[%c0_42, %c0_43, %c0_44] : memref<1x4x128xf32, #tpu.memory_space<vmem>>, vector<1x4x128xf32>
      %53 = vector.shape_cast %52 : vector<1x4x128xf32> to vector<4x128xf32>
      %54 = arith.truncf %53 : vector<4x128xf32> to vector<4x128xbf16>
      %c0_45 = arith.constant 0 : index
      %c0_46 = arith.constant 0 : index
      %55 = vector.load %arg11[%c0_45, %c0_46] : memref<16x640xbf16, #tpu.memory_space<vmem>>, vector<4x128xbf16>
      tpu.vector_store %arg11[%c0_45, %c0_46], %54 {strides = array<i32>} : memref<16x640xbf16, #tpu.memory_space<vmem>>, vector<4x128xbf16>,
    } else {
    }
    %c0_5 = arith.constant 0 : index
    %c128 = arith.constant 128 : index
    %9 = vector.load %arg11[%c0_5, %c128] : memref<16x640xbf16, #tpu.memory_space<vmem>>, vector<4x512xbf16>
    tpu.vector_store %arg11[%c0_5, %c128], %2 {strides = array<i32>} : memref<16x640xbf16, #tpu.memory_space<vmem>>, vector<4x512xbf16>,
    %cst = arith.constant 0.000000e+00 : bf16
    %10 = vector.broadcast %cst : bf16 to vector<12x640xbf16>
    %c4 = arith.constant 4 : index
    %c0_6 = arith.constant 0 : index
    %11 = vector.load %arg11[%c4, %c0_6] : memref<16x640xbf16, #tpu.memory_space<vmem>>, vector<12x640xbf16>
    tpu.vector_store %arg11[%c4, %c0_6], %10 {strides = array<i32>} : memref<16x640xbf16, #tpu.memory_space<vmem>>, vector<12x640xbf16>,
    %c0_7 = arith.constant 0 : index
    %c120 = arith.constant 120 : index
    %12 = vector.load %arg11[%c0_7, %c120] : memref<16x640xbf16, #tpu.memory_space<vmem>>, vector<16x516xbf16>
    %c0_8 = arith.constant 0 : index
    %c122 = arith.constant 122 : index
    %13 = vector.load %arg11[%c0_8, %c122] : memref<16x640xbf16, #tpu.memory_space<vmem>>, vector<16x516xbf16>
    %c0_9 = arith.constant 0 : index
    %c124 = arith.constant 124 : index
    %14 = vector.load %arg11[%c0_9, %c124] : memref<16x640xbf16, #tpu.memory_space<vmem>>, vector<16x516xbf16>
    %15 = tpu.concatenate %12, %13, %14 in 0 : vector<16x516xbf16>, vector<16x516xbf16>, vector<16x516xbf16> -> vector<48x516xbf16>
    %c0_10 = arith.constant 0 : index
    %c0_11 = arith.constant 0 : index
    %16 = vector.load %arg4[%c0_10, %c0_11] : memref<8x48xbf16, #tpu.memory_space<vmem>>, vector<8x48xbf16>
    %cst_12 = arith.constant dense<0.000000e+00> : vector<8x516xf32>
    %17 = tpu.matmul %16, %15, %cst_12 {dimension_numbers = #tpu.dot_dimension_numbers<[1], [0], [0], [1], [0, 0, 1, 1], [], []>} : vector<8x48xbf16>, vector<48x516xbf16>, vector<8x516xf32> -> vector<8x516xf32>
    %c0_13 = arith.constant 0 : index
    %c0_14 = arith.constant 0 : index
    %18 = vector.load %arg5[%c0_13, %c0_14] : memref<8x1xf32, #tpu.memory_space<vmem>>, vector<8x1xf32>
    %19 = vector.broadcast %18 : vector<8x1xf32> to vector<8x516xf32>
    %20 = arith.addf %17, %19 : vector<8x516xf32>
    %cst_15 = arith.constant 0.000000e+00 : f32
    %21 = vector.broadcast %cst_15 : f32 to vector<8x516xf32>
    %22 = arith.maximumf %20, %21 : vector<8x516xf32>
    %23 = arith.truncf %22 : vector<8x516xf32> to vector<8x516xbf16>
    %c0_16 = arith.constant 0 : index
    %c0_17 = arith.constant 0 : index
    %24 = vector.load %arg12[%c0_16, %c0_17] : memref<16x516xbf16, #tpu.memory_space<vmem>>, vector<8x516xbf16>
    tpu.vector_store %arg12[%c0_16, %c0_17], %23 {strides = array<i32>} : memref<16x516xbf16, #tpu.memory_space<vmem>>, vector<8x516xbf16>,
    %cst_18 = arith.constant 0.000000e+00 : bf16
    %25 = vector.broadcast %cst_18 : bf16 to vector<8x516xbf16>
    %c8 = arith.constant 8 : index
    %c0_19 = arith.constant 0 : index
    %26 = vector.load %arg12[%c8, %c0_19] : memref<16x516xbf16, #tpu.memory_space<vmem>>, vector<8x516xbf16>
    tpu.vector_store %arg12[%c8, %c0_19], %25 {strides = array<i32>} : memref<16x516xbf16, #tpu.memory_space<vmem>>, vector<8x516xbf16>,
    %c0_i32_20 = arith.constant 0 : i32
    %27 = arith.cmpi eq, %arg1, %c0_i32_20 : i32
    %28 = arith.extui %27 : i1 to i32
    %c0_i32_21 = arith.constant 0 : i32
    %29 = arith.cmpi ne, %28, %c0_i32_21 : i32
    scf.if %29 {
      %cst_42 = arith.constant 0.000000e+00 : bf16
      %52 = vector.broadcast %cst_42 : bf16 to vector<8x4xbf16>
      %c0_43 = arith.constant 0 : index
      %c0_44 = arith.constant 0 : index
      %53 = vector.load %arg12[%c0_43, %c0_44] : memref<16x516xbf16, #tpu.memory_space<vmem>>, vector<8x4xbf16>
      tpu.vector_store %arg12[%c0_43, %c0_44], %52 {strides = array<i32>} : memref<16x516xbf16, #tpu.memory_space<vmem>>, vector<8x4xbf16>,
    } else {
    }
    %c0_22 = arith.constant 0 : index
    %c0_23 = arith.constant 0 : index
    %30 = vector.load %arg12[%c0_22, %c0_23] : memref<16x516xbf16, #tpu.memory_space<vmem>>, vector<16x512xbf16>
    %c0_24 = arith.constant 0 : index
    %c2 = arith.constant 2 : index
    %31 = vector.load %arg12[%c0_24, %c2] : memref<16x516xbf16, #tpu.memory_space<vmem>>, vector<16x512xbf16>
    %c0_25 = arith.constant 0 : index
    %c4_26 = arith.constant 4 : index
    %32 = vector.load %arg12[%c0_25, %c4_26] : memref<16x516xbf16, #tpu.memory_space<vmem>>, vector<16x512xbf16>
    %33 = tpu.concatenate %30, %31, %32 in 0 : vector<16x512xbf16>, vector<16x512xbf16>, vector<16x512xbf16> -> vector<48x512xbf16>
    %c0_27 = arith.constant 0 : index
    %c0_28 = arith.constant 0 : index
    %34 = vector.load %arg6[%c0_27, %c0_28] : memref<8x48xbf16, #tpu.memory_space<vmem>>, vector<8x48xbf16>
    %cst_29 = arith.constant dense<0.000000e+00> : vector<8x512xf32>
    %35 = tpu.matmul %34, %33, %cst_29 {dimension_numbers = #tpu.dot_dimension_numbers<[1], [0], [0], [1], [0, 0, 1, 1], [], []>} : vector<8x48xbf16>, vector<48x512xbf16>, vector<8x512xf32> -> vector<8x512xf32>
    %c0_30 = arith.constant 0 : index
    %c0_31 = arith.constant 0 : index
    %36 = vector.load %arg7[%c0_30, %c0_31] : memref<8x1xf32, #tpu.memory_space<vmem>>, vector<8x1xf32>
    %37 = vector.broadcast %36 : vector<8x1xf32> to vector<8x512xf32>
    %38 = arith.addf %35, %37 : vector<8x512xf32>
    %cst_32 = arith.constant 0.000000e+00 : f32
    %39 = vector.broadcast %cst_32 : f32 to vector<8x512xf32>
    %40 = arith.maximumf %38, %39 : vector<8x512xf32>
    %c0_33 = arith.constant 0 : index
    %c0_34 = arith.constant 0 : index
    %41 = vector.load %arg8[%c0_33, %c0_34] : memref<8x4xbf16, #tpu.memory_space<vmem>>, vector<8x4xbf16>
    %cst_35 = arith.constant dense<0.000000e+00> : vector<8x512xf32>
    %42 = tpu.matmul %41, %2, %cst_35 {dimension_numbers = #tpu.dot_dimension_numbers<[1], [0], [0], [1], [0, 0, 1, 1], [], []>} : vector<8x4xbf16>, vector<4x512xbf16>, vector<8x512xf32> -> vector<8x512xf32>
    %c0_36 = arith.constant 0 : index
    %c0_37 = arith.constant 0 : index
    %43 = vector.load %arg9[%c0_36, %c0_37] : memref<8x1xf32, #tpu.memory_space<vmem>>, vector<8x1xf32>
    %44 = vector.broadcast %43 : vector<8x1xf32> to vector<8x512xf32>
    %45 = arith.addf %42, %44 : vector<8x512xf32>
    %46 = arith.addf %40, %45 : vector<8x512xf32>
    %cst_38 = arith.constant 0.000000e+00 : f32
    %47 = vector.broadcast %cst_38 : f32 to vector<8x512xf32>
    %48 = arith.maximumf %46, %47 : vector<8x512xf32>
    %c0_39 = arith.constant 0 : index
    %c0_40 = arith.constant 0 : index
    %c0_41 = arith.constant 0 : index
    %49 = vector.load %arg10[%c0_39, %c0_40, %c0_41] : memref<1x8x512xf32, #tpu.memory_space<vmem>>, vector<1x8x512xf32>
    %50 = vector.shape_cast %49 : vector<1x8x512xf32> to vector<8x512xf32>
    %51 = vector.shape_cast %48 : vector<8x512xf32> to vector<1x8x512xf32>
    tpu.vector_store %arg10[%c0_39, %c0_40, %c0_41], %51 {strides = array<i32>} : memref<1x8x512xf32, #tpu.memory_space<vmem>>, vector<1x8x512xf32>,
    return
  }
  func.func @transform_0(%arg0: i32, %arg1: i32) -> (i32, i32, i32) {
    %c0_i32 = arith.constant 0 : i32
    %c0_i32_0 = arith.constant 0 : i32
    return %arg0, %c0_i32, %arg1 : i32, i32, i32
  }
  func.func @transform_1(%arg0: i32, %arg1: i32) -> (i32, i32, i32) {
    %c4_i32 = arith.constant 4 : i32
    %0 = arith.muli %arg1, %c4_i32 : i32
    %c1_i32 = arith.constant 1 : i32
    %1 = arith.subi %0, %c1_i32 : i32
    %c0_i32 = arith.constant 0 : i32
    %2 = arith.maxsi %1, %c0_i32 : i32
    %c0_i32_0 = arith.constant 0 : i32
    %c0_i32_1 = arith.constant 0 : i32
    return %arg0, %c0_i32_0, %2 : i32, i32, i32
  }
  func.func @transform_2(%arg0: i32, %arg1: i32) -> (i32, i32) {
    %c0_i32 = arith.constant 0 : i32
    %c0_i32_0 = arith.constant 0 : i32
    %c0_i32_1 = arith.constant 0 : i32
    return %c0_i32, %c0_i32_0 : i32, i32
  }
  func.func @transform_3(%arg0: i32, %arg1: i32) -> (i32, i32) {
    %c0_i32 = arith.constant 0 : i32
    %c0_i32_0 = arith.constant 0 : i32
    %c0_i32_1 = arith.constant 0 : i32
    return %c0_i32, %c0_i32_0 : i32, i32
  }
  func.func @transform_4(%arg0: i32, %arg1: i32) -> (i32, i32) {
    %c0_i32 = arith.constant 0 : i32
    %c0_i32_0 = arith.constant 0 : i32
    %c0_i32_1 = arith.constant 0 : i32
    return %c0_i32, %c0_i32_0 : i32, i32
  }
  func.func @transform_5(%arg0: i32, %arg1: i32) -> (i32, i32) {
    %c0_i32 = arith.constant 0 : i32
    %c0_i32_0 = arith.constant 0 : i32
    %c0_i32_1 = arith.constant 0 : i32
    return %c0_i32, %c0_i32_0 : i32, i32
  }
  func.func @transform_6(%arg0: i32, %arg1: i32) -> (i32, i32) {
    %c0_i32 = arith.constant 0 : i32
    %c0_i32_0 = arith.constant 0 : i32
    %c0_i32_1 = arith.constant 0 : i32
    return %c0_i32, %c0_i32_0 : i32, i32
  }
  func.func @transform_7(%arg0: i32, %arg1: i32) -> (i32, i32) {
    %c0_i32 = arith.constant 0 : i32
    %c0_i32_0 = arith.constant 0 : i32
    %c0_i32_1 = arith.constant 0 : i32
    return %c0_i32, %c0_i32_0 : i32, i32
  }
  func.func @transform_8(%arg0: i32, %arg1: i32) -> (i32, i32, i32) {
    %c0_i32 = arith.constant 0 : i32
    %c0_i32_0 = arith.constant 0 : i32
    return %arg0, %c0_i32, %arg1 : i32, i32, i32
  }
}

module attributes {stable_mosaic.version = 11 : i64} {
  func.func @temporal_block_kernel(%arg0: i32, %arg1: i32, %arg2: memref<1x4x512xf32, #tpu.memory_space<vmem>>, %arg3: memref<1x4x128xf32, #tpu.memory_space<vmem>>, %arg4: memref<8x48xbf16, #tpu.memory_space<vmem>>, %arg5: memref<8x1xf32, #tpu.memory_space<vmem>>, %arg6: memref<8x48xbf16, #tpu.memory_space<vmem>>, %arg7: memref<8x1xf32, #tpu.memory_space<vmem>>, %arg8: memref<8x4xbf16, #tpu.memory_space<vmem>>, %arg9: memref<8x1xf32, #tpu.memory_space<vmem>>, %arg10: memref<1x8x512xf32, #tpu.memory_space<vmem>>, %arg11: memref<16x640xbf16, #tpu.memory_space<vmem>>, %arg12: memref<16x516xbf16, #tpu.memory_space<vmem>>) attributes {dimension_semantics = [#tpu.dimension_semantics<parallel>, #tpu.dimension_semantics<parallel>], iteration_bounds = array<i64: 2, 2>, scalar_prefetch = 0 : i64, scratch_operands = 2 : i64, tpu.core_type = #tpu.core_type<tc>, window_params = [{transform_indices = @transform_0, window_bounds = array<i64: 1, 4, 512>}, {transform_indices = @transform_1, window_bounds = array<i64: 1, 4, 128>}, {pipeline_mode = #tpu.pipeline_mode<synchronous>, transform_indices = @transform_2, window_bounds = array<i64: 8, 48>}, {pipeline_mode = #tpu.pipeline_mode<synchronous>, transform_indices = @transform_3, window_bounds = array<i64: 8, 1>}, {pipeline_mode = #tpu.pipeline_mode<synchronous>, transform_indices = @transform_4, window_bounds = array<i64: 8, 48>}, {pipeline_mode = #tpu.pipeline_mode<synchronous>, transform_indices = @transform_5, window_bounds = array<i64: 8, 1>}, {pipeline_mode = #tpu.pipeline_mode<synchronous>, transform_indices = @transform_6, window_bounds = array<i64: 8, 4>}, {pipeline_mode = #tpu.pipeline_mode<synchronous>, transform_indices = @transform_7, window_bounds = array<i64: 8, 1>}, {transform_indices = @transform_8, window_bounds = array<i64: 1, 8, 512>}]} {
    %c0 = arith.constant 0 : index
    %c0_0 = arith.constant 0 : index
    %c0_1 = arith.constant 0 : index
    %0 = vector.load %arg2[%c0, %c0_0, %c0_1] : memref<1x4x512xf32, #tpu.memory_space<vmem>>, vector<1x4x512xf32>
    %1 = vector.shape_cast %0 : vector<1x4x512xf32> to vector<4x512xf32>
    %2 = arith.truncf %1 : vector<4x512xf32> to vector<4x512xbf16>
    %c0_i32 = arith.constant 0 : i32
    %3 = arith.cmpi eq, %arg1, %c0_i32 : i32
    %4 = arith.extui %3 : i1 to i32
    %c0_i32_2 = arith.constant 0 : i32
    %5 = arith.cmpi ne, %4, %c0_i32_2 : i32
    scf.if %5 {
      %cst_42 = arith.constant 0.000000e+00 : bf16
      %52 = vector.broadcast %cst_42 : bf16 to vector<4x128xbf16>
      %c0_43 = arith.constant 0 : index
      %c0_44 = arith.constant 0 : index
      %53 = vector.load %arg11[%c0_43, %c0_44] : memref<16x640xbf16, #tpu.memory_space<vmem>>, vector<4x128xbf16>
      tpu.vector_store %arg11[%c0_43, %c0_44], %52 {strides = array<i32>} : memref<16x640xbf16, #tpu.memory_space<vmem>>, vector<4x128xbf16>,
    } else {
    }
    %c0_i32_3 = arith.constant 0 : i32
    %6 = arith.cmpi sgt, %arg1, %c0_i32_3 : i32
    %7 = arith.extui %6 : i1 to i32
    %c0_i32_4 = arith.constant 0 : i32
    %8 = arith.cmpi ne, %7, %c0_i32_4 : i32
    scf.if %8 {
      %c0_42 = arith.constant 0 : index
      %c0_43 = arith.constant 0 : index
      %c0_44 = arith.constant 0 : index
      %52 = vector.load %arg3[%c0_42, %c0_43, %c0_44] : memref<1x4x128xf32, #tpu.memory_space<vmem>>, vector<1x4x128xf32>
      %53 = vector.shape_cast %52 : vector<1x4x128xf32> to vector<4x128xf32>
      %54 = arith.truncf %53 : vector<4x128xf32> to vector<4x128xbf16>
      %c0_45 = arith.constant 0 : index
      %c0_46 = arith.constant 0 : index
      %55 = vector.load %arg11[%c0_45, %c0_46] : memref<16x640xbf16, #tpu.memory_space<vmem>>, vector<4x128xbf16>
      tpu.vector_store %arg11[%c0_45, %c0_46], %54 {strides = array<i32>} : memref<16x640xbf16, #tpu.memory_space<vmem>>, vector<4x128xbf16>,
    } else {
    }
    %c0_5 = arith.constant 0 : index
    %c128 = arith.constant 128 : index
    %9 = vector.load %arg11[%c0_5, %c128] : memref<16x640xbf16, #tpu.memory_space<vmem>>, vector<4x512xbf16>
    tpu.vector_store %arg11[%c0_5, %c128], %2 {strides = array<i32>} : memref<16x640xbf16, #tpu.memory_space<vmem>>, vector<4x512xbf16>,
    %cst = arith.constant 0.000000e+00 : bf16
    %10 = vector.broadcast %cst : bf16 to vector<12x640xbf16>
    %c4 = arith.constant 4 : index
    %c0_6 = arith.constant 0 : index
    %11 = vector.load %arg11[%c4, %c0_6] : memref<16x640xbf16, #tpu.memory_space<vmem>>, vector<12x640xbf16>
    tpu.vector_store %arg11[%c4, %c0_6], %10 {strides = array<i32>} : memref<16x640xbf16, #tpu.memory_space<vmem>>, vector<12x640xbf16>,
    %c0_7 = arith.constant 0 : index
    %c120 = arith.constant 120 : index
    %12 = vector.load %arg11[%c0_7, %c120] : memref<16x640xbf16, #tpu.memory_space<vmem>>, vector<16x516xbf16>
    %c0_8 = arith.constant 0 : index
    %c122 = arith.constant 122 : index
    %13 = vector.load %arg11[%c0_8, %c122] : memref<16x640xbf16, #tpu.memory_space<vmem>>, vector<16x516xbf16>
    %c0_9 = arith.constant 0 : index
    %c124 = arith.constant 124 : index
    %14 = vector.load %arg11[%c0_9, %c124] : memref<16x640xbf16, #tpu.memory_space<vmem>>, vector<16x516xbf16>
    %15 = tpu.concatenate %12, %13, %14 in 0 : vector<16x516xbf16>, vector<16x516xbf16>, vector<16x516xbf16> -> vector<48x516xbf16>
    %c0_10 = arith.constant 0 : index
    %c0_11 = arith.constant 0 : index
    %16 = vector.load %arg4[%c0_10, %c0_11] : memref<8x48xbf16, #tpu.memory_space<vmem>>, vector<8x48xbf16>
    %cst_12 = arith.constant dense<0.000000e+00> : vector<8x516xf32>
    %17 = tpu.matmul %16, %15, %cst_12 {dimension_numbers = #tpu.dot_dimension_numbers<[1], [0], [0], [1], [0, 0, 1, 1], [], []>} : vector<8x48xbf16>, vector<48x516xbf16>, vector<8x516xf32> -> vector<8x516xf32>
    %c0_13 = arith.constant 0 : index
    %c0_14 = arith.constant 0 : index
    %18 = vector.load %arg5[%c0_13, %c0_14] : memref<8x1xf32, #tpu.memory_space<vmem>>, vector<8x1xf32>
    %19 = vector.broadcast %18 : vector<8x1xf32> to vector<8x516xf32>
    %20 = arith.addf %17, %19 : vector<8x516xf32>
    %cst_15 = arith.constant 0.000000e+00 : f32
    %21 = vector.broadcast %cst_15 : f32 to vector<8x516xf32>
    %22 = arith.maximumf %20, %21 : vector<8x516xf32>
    %23 = arith.truncf %22 : vector<8x516xf32> to vector<8x516xbf16>
    %c0_16 = arith.constant 0 : index
    %c0_17 = arith.constant 0 : index
    %24 = vector.load %arg12[%c0_16, %c0_17] : memref<16x516xbf16, #tpu.memory_space<vmem>>, vector<8x516xbf16>
    tpu.vector_store %arg12[%c0_16, %c0_17], %23 {strides = array<i32>} : memref<16x516xbf16, #tpu.memory_space<vmem>>, vector<8x516xbf16>,
    %cst_18 = arith.constant 0.000000e+00 : bf16
    %25 = vector.broadcast %cst_18 : bf16 to vector<8x516xbf16>
    %c8 = arith.constant 8 : index
    %c0_19 = arith.constant 0 : index
    %26 = vector.load %arg12[%c8, %c0_19] : memref<16x516xbf16, #tpu.memory_space<vmem>>, vector<8x516xbf16>
    tpu.vector_store %arg12[%c8, %c0_19], %25 {strides = array<i32>} : memref<16x516xbf16, #tpu.memory_space<vmem>>, vector<8x516xbf16>,
    %c0_i32_20 = arith.constant 0 : i32
    %27 = arith.cmpi eq, %arg1, %c0_i32_20 : i32
    %28 = arith.extui %27 : i1 to i32
    %c0_i32_21 = arith.constant 0 : i32
    %29 = arith.cmpi ne, %28, %c0_i32_21 : i32
    scf.if %29 {
      %cst_42 = arith.constant 0.000000e+00 : bf16
      %52 = vector.broadcast %cst_42 : bf16 to vector<8x4xbf16>
      %c0_43 = arith.constant 0 : index
      %c0_44 = arith.constant 0 : index
      %53 = vector.load %arg12[%c0_43, %c0_44] : memref<16x516xbf16, #tpu.memory_space<vmem>>, vector<8x4xbf16>
      tpu.vector_store %arg12[%c0_43, %c0_44], %52 {strides = array<i32>} : memref<16x516xbf16, #tpu.memory_space<vmem>>, vector<8x4xbf16>,
    } else {
    }
    %c0_22 = arith.constant 0 : index
    %c0_23 = arith.constant 0 : index
    %30 = vector.load %arg12[%c0_22, %c0_23] : memref<16x516xbf16, #tpu.memory_space<vmem>>, vector<16x512xbf16>
    %c0_24 = arith.constant 0 : index
    %c2 = arith.constant 2 : index
    %31 = vector.load %arg12[%c0_24, %c2] : memref<16x516xbf16, #tpu.memory_space<vmem>>, vector<16x512xbf16>
    %c0_25 = arith.constant 0 : index
    %c4_26 = arith.constant 4 : index
    %32 = vector.load %arg12[%c0_25, %c4_26] : memref<16x516xbf16, #tpu.memory_space<vmem>>, vector<16x512xbf16>
    %33 = tpu.concatenate %30, %31, %32 in 0 : vector<16x512xbf16>, vector<16x512xbf16>, vector<16x512xbf16> -> vector<48x512xbf16>
    %c0_27 = arith.constant 0 : index
    %c0_28 = arith.constant 0 : index
    %34 = vector.load %arg6[%c0_27, %c0_28] : memref<8x48xbf16, #tpu.memory_space<vmem>>, vector<8x48xbf16>
    %cst_29 = arith.constant dense<0.000000e+00> : vector<8x512xf32>
    %35 = tpu.matmul %34, %33, %cst_29 {dimension_numbers = #tpu.dot_dimension_numbers<[1], [0], [0], [1], [0, 0, 1, 1], [], []>} : vector<8x48xbf16>, vector<48x512xbf16>, vector<8x512xf32> -> vector<8x512xf32>
    %c0_30 = arith.constant 0 : index
    %c0_31 = arith.constant 0 : index
    %36 = vector.load %arg7[%c0_30, %c0_31] : memref<8x1xf32, #tpu.memory_space<vmem>>, vector<8x1xf32>
    %37 = vector.broadcast %36 : vector<8x1xf32> to vector<8x512xf32>
    %38 = arith.addf %35, %37 : vector<8x512xf32>
    %cst_32 = arith.constant 0.000000e+00 : f32
    %39 = vector.broadcast %cst_32 : f32 to vector<8x512xf32>
    %40 = arith.maximumf %38, %39 : vector<8x512xf32>
    %c0_33 = arith.constant 0 : index
    %c0_34 = arith.constant 0 : index
    %41 = vector.load %arg8[%c0_33, %c0_34] : memref<8x4xbf16, #tpu.memory_space<vmem>>, vector<8x4xbf16>
    %cst_35 = arith.constant dense<0.000000e+00> : vector<8x512xf32>
    %42 = tpu.matmul %41, %2, %cst_35 {dimension_numbers = #tpu.dot_dimension_numbers<[1], [0], [0], [1], [0, 0, 1, 1], [], []>} : vector<8x4xbf16>, vector<4x512xbf16>, vector<8x512xf32> -> vector<8x512xf32>
    %c0_36 = arith.constant 0 : index
    %c0_37 = arith.constant 0 : index
    %43 = vector.load %arg9[%c0_36, %c0_37] : memref<8x1xf32, #tpu.memory_space<vmem>>, vector<8x1xf32>
    %44 = vector.broadcast %43 : vector<8x1xf32> to vector<8x512xf32>
    %45 = arith.addf %42, %44 : vector<8x512xf32>
    %46 = arith.addf %40, %45 : vector<8x512xf32>
    %cst_38 = arith.constant 0.000000e+00 : f32
    %47 = vector.broadcast %cst_38 : f32 to vector<8x512xf32>
    %48 = arith.maximumf %46, %47 : vector<8x512xf32>
    %c0_39 = arith.constant 0 : index
    %c0_40 = arith.constant 0 : index
    %c0_41 = arith.constant 0 : index
    %49 = vector.load %arg10[%c0_39, %c0_40, %c0_41] : memref<1x8x512xf32, #tpu.memory_space<vmem>>, vector<1x8x512xf32>
    %50 = vector.shape_cast %49 : vector<1x8x512xf32> to vector<8x512xf32>
    %51 = vector.shape_cast %48 : vector<8x512xf32> to vector<1x8x512xf32>
    tpu.vector_store %arg10[%c0_39, %c0_40, %c0_41], %51 {strides = array<i32>} : memref<1x8x512xf32, #tpu.memory_space<vmem>>, vector<1x8x512xf32>,
    return
  }
  func.func @transform_0(%arg0: i32, %arg1: i32) -> (i32, i32, i32) {
    %c0_i32 = arith.constant 0 : i32
    %c0_i32_0 = arith.constant 0 : i32
    return %arg0, %c0_i32, %arg1 : i32, i32, i32
  }
  func.func @transform_1(%arg0: i32, %arg1: i32) -> (i32, i32, i32) {
    %c4_i32 = arith.constant 4 : i32
    %0 = arith.muli %arg1, %c4_i32 : i32
    %c1_i32 = arith.constant 1 : i32
    %1 = arith.subi %0, %c1_i32 : i32
    %c0_i32 = arith.constant 0 : i32
    %2 = arith.maxsi %1, %c0_i32 : i32
    %c0_i32_0 = arith.constant 0 : i32
    %c0_i32_1 = arith.constant 0 : i32
    return %arg0, %c0_i32_0, %2 : i32, i32, i32
  }
  func.func @transform_2(%arg0: i32, %arg1: i32) -> (i32, i32) {
    %c0_i32 = arith.constant 0 : i32
    %c0_i32_0 = arith.constant 0 : i32
    %c0_i32_1 = arith.constant 0 : i32
    return %c0_i32, %c0_i32_0 : i32, i32
  }
  func.func @transform_3(%arg0: i32, %arg1: i32) -> (i32, i32) {
    %c0_i32 = arith.constant 0 : i32
    %c0_i32_0 = arith.constant 0 : i32
    %c0_i32_1 = arith.constant 0 : i32
    return %c0_i32, %c0_i32_0 : i32, i32
  }
  func.func @transform_4(%arg0: i32, %arg1: i32) -> (i32, i32) {
    %c0_i32 = arith.constant 0 : i32
    %c0_i32_0 = arith.constant 0 : i32
    %c0_i32_1 = arith.constant 0 : i32
    return %c0_i32, %c0_i32_0 : i32, i32
  }
  func.func @transform_5(%arg0: i32, %arg1: i32) -> (i32, i32) {
    %c0_i32 = arith.constant 0 : i32
    %c0_i32_0 = arith.constant 0 : i32
    %c0_i32_1 = arith.constant 0 : i32
    return %c0_i32, %c0_i32_0 : i32, i32
  }
  func.func @transform_6(%arg0: i32, %arg1: i32) -> (i32, i32) {
    %c0_i32 = arith.constant 0 : i32
    %c0_i32_0 = arith.constant 0 : i32
    %c0_i32_1 = arith.constant 0 : i32
    return %c0_i32, %c0_i32_0 : i32, i32
  }
  func.func @transform_7(%arg0: i32, %arg1: i32) -> (i32, i32) {
    %c0_i32 = arith.constant 0 : i32
    %c0_i32_0 = arith.constant 0 : i32
    %c0_i32_1 = arith.constant 0 : i32
    return %c0_i32, %c0_i32_0 : i32, i32
  }
  func.func @transform_8(%arg0: i32, %arg1: i32) -> (i32, i32, i32) {
    %c0_i32 = arith.constant 0 : i32
    %c0_i32_0 = arith.constant 0 : i32
    return %arg0, %c0_i32, %arg1 : i32, i32, i32
  }
}

</mosaic_0001>

<bundles_post_ra>
// kernel: tpu_custom_call.1
= control target key start
LH: loop header
LB: loop body
LE: loop exit
PB: predicated region body
PF: predicated region fallthrough
CT: control target
= control target key end

     0   :  { %s1963_s0 = inlined_call_operand.hbm [shape: f32[2,4,1024], index: 0, kind: input, shape index: {}]   ;;  %s1964_s1 = inlined_call_operand.hbm [shape: f32[2,4,1024], index: 1, kind: input, shape index: {}]   ;;  %s1965_s2 = inlined_call_operand.vmem [shape: bf16[8,48], index: 2, kind: input, shape index: {}]   ;;  %s1966_s3 = inlined_call_operand.vmem [shape: f32[8,1], index: 3, kind: input, shape index: {}]   ;;  %s1967_s4 = inlined_call_operand.vmem [shape: bf16[8,48], index: 4, kind: input, shape index: {}]   ;;  %s1968_s5 = inlined_call_operand.vmem [shape: f32[8,1], index: 5, kind: input, shape index: {}]   ;;  %s1969_s6 = inlined_call_operand.vmem [shape: bf16[8,4], index: 6, kind: input, shape index: {}]   ;;  %s1970_s7 = inlined_call_operand.vmem [shape: f32[8,1], index: 7, kind: input, shape index: {}]   ;;  %s1971_s8 = inlined_call_operand.hbm [shape: f32[2,8,1024], index: 8, kind: output, shape index: {}]  }
   0x1   :  { %1982 = sst [smem:[#allocation18_spill]] %s1963_s0 }
   0x2   :  { %1983 = sst [smem:[#allocation19_spill]] %s1965_s2 }
   0x3   :  { %1984 = sst [smem:[#allocation20_spill]] %s1966_s3 }
   0x4   :  { %1985 = sst [smem:[#allocation21_spill]] %s1967_s4 }
   0x5   :  { %1986 = sst [smem:[#allocation22_spill]] %s1968_s5 }
   0x6   :  { %1987 = sst [smem:[#allocation23_spill]] %s1969_s6 }
   0x7   :  { %1988 = sst [smem:[#allocation24_spill]] %s1970_s7 }
   0x8   :  { %1989 = sst [smem:[#allocation25_spill]] %s1971_s8 }
   0x9   :  { %13 = vsyncpa [#allocation5], 0 }
   0xa   :  { %15 = vsyncpa [#allocation5 + $0x1], 0 }
   0xb   :  { %16 = vsyncpa [#allocation8], 0 }
   0xc   :  { %18 = vsyncpa [#allocation8 + $0x1], 0 }
   0xd   :  { %19 = vsyncpa [#allocation6], 0 }
   0xe   :  { %21 = vsyncpa [#allocation6 + $0x1], 0  ;;  %s1497_s27 = smov 0   ;;  %s1499_s28 = smov 0  }
   0xf   :  { %s1501_s29 = smov 0   ;;  %s1503_s30 = smov 0  }
  0x10   :  { %s1505_s9 = smov 0   ;;  %s1507_s10 = smov 0  }
  0x11   :  { %s1509_s11 = smov 0   ;;  %s1511_s12 = smov 0  }
  0x12   :  { %s1513_s13 = smov 0   ;;  %s1515_s14 = smov 0  }
  0x13   :  { %s1517_s15 = smov 0  }
  0x14 LB: > { %1990 = sst [smem:[#allocation13_spill]] %s1411_s30  ;;  %s1079_s16 = sadd.s32 4294967295, %s1439_s15   ;;  %s1439_s15 = sphi %s1517_s15, %s27_s15   ;;  %s1435_s14 = sphi %s1515_s14, %s2036_s14   ;;  %s1431_s13 = sphi %s1513_s13, %s2027_s13   ;;  %s1427_s12 = sphi %s1511_s12, %s2035_s12   ;;  %s1423_s11 = sphi %s1509_s11, %s2026_s11   ;;  %s1419_s10 = sphi %s1507_s10, %s2034_s10   ;;  %s1415_s9 = sphi %s1505_s9, %s2033_s9   ;;  %s1411_s30 = sphi %s1503_s30, %s2032_s30   ;;  %s1407_s29 = sphi %s1501_s29, %s2031_s29   ;;  %s1403_s28 = sphi %s1499_s28, %s2030_s28   ;;  %s1399_s27 = sphi %s1497_s27, %s2029_s27  }
  0x15   : > { %1991 = sst [smem:[#allocation14_spill]] %s1427_s12  ;;  %s1080_s17 = sadd.s32 4294967294, %s1439_s15  }
  0x16   : > { %1992 = sst [smem:[#allocation15_spill]] %s1431_s13  ;;  %s36_s18 = sadd.s32 1, %s1431_s13 }
  0x17   : > { %s39_s19 = sadd.s32 1, %s1435_s14  ;;  %p37_p0 = scmp.ge.s32.totalorder %s36_s18, 2 }
  0x18   : > { %p55_p1 = scmp.ne.s32.totalorder %s1419_s10, %s1415_s9  ;;  %p1974_p2 = scmp.eq.s32.totalorder %s1439_s15, 0 }
  0x19   : > { %s2038_s18 = smov (%p37_p0, %s36_s18), 0  ;;  %s2040_s19 = smov (!%p37_p0, %s39_s19), %s1435_s14 }
  0x1a   : > { %1993 = sst [smem:[#allocation16_spill]] %s2038_s18  ;;  %p1572_p3 = por %p1974_p2, %p55_p1 }
  0x1b   : > { %p61_p4 = scmp.ne.s32.totalorder %s1415_s9, %s1411_s30  ;;  %p1578_p5 = scmp.eq.s32.totalorder %s1079_s16, 0 }
  0x1c   : > { %s1081_s24 = sshll.u32 %s1431_s13, 2  ;;  %p249_p6 = scmp.eq.s32.totalorder %s1079_s16, 3 }
  0x1d   : > { %p1585_p7 = por %p1578_p5, %p61_p4  ;;  %s1589_s26 = sadd.s32 4294967295, %s1081_s24 }
  0x1e   : > { %p1595_p9 = por %p249_p6, %p55_p1  ;;  %p255_p10 = scmp.eq.s32.totalorder %s1080_s17, 3 }
  0x1f   : > { %s1996_s25 = scalar_select %p1585_p7, 1, 0 }
  0x20   : > { %s1997_s20 = scalar_select %p1595_p9, 1, 0 }
  0x21   : > { %p1975_p11 = scmp.lt.s32.totalorder %s1439_s15, 4  ;;  %s293_s16 = sand.u32 1, %s1419_s10  }
  0x22   : > { %p1601_p12 = por %p255_p10, %p61_p4  ;;  %s1087_s30 = sshll.u32 %s293_s16, 4 }
  0x23   : > { %s1089_s8 = sshll.u32 %s1435_s14, 3  ;;  %s297_s4 = scalar_lea.vmem [#allocation4], %s1087_s30 }
  0x24   : > { %s1998_s21 = scalar_select %p1601_p12, 1, 0 }
  0x25   : > { %s303_s12 = sadd.s32 %s1089_s8, %s1081_s24  ;;  %s307_s7 = sshll.u32 %s297_s4, 4  ;;  %s1613_s7 = int_to_ptr.vmem [resolvable:$true] %s307_s7 }
  0x26   : > { %s1090_s6 = sshll.u32 %s303_s12, 6  ;;  %s1999_s0 = sld [smem:[#allocation18_spill]] }
  0x27   : > { %p1619_p13 = pnand %p1975_p11, %p1572_p3  ;;  %s294_s4 = scalar_lea.sflag [#allocation5], %s293_s16 }
  0x29   : > { %p1255_p6 = pneg %p1619_p13 }
  0x2c   : > { %s1611_s3 = scalar_lea.hbm %s1999_s0, %s1090_s6  ;;  %s1258_s30 = scalar_lea.hbm %s1999_s0, 1024 }
  0x2d   : > { %s1253_s2 = scalar_lea.hbm %s1611_s3, 256  ;;  %p1259_p3 = scmp.lt.u32.totalorder %s1611_s3, %s1999_s0 }
  0x2e   : > { %p1254_p4 = scmp.ne.s32.totalorder %s1611_s3, %s1253_s2  ;;  %p1260_p11 = scmp.lt.u32.totalorder %s1258_s30, %s1253_s2 }
  0x2f   : > { %p1262_p0 = scmp.lt.u32.totalorder %s1253_s2, %s1611_s3 }
  0x30   : > { %p1256_p10 = pnand %p1255_p6, %p1254_p4  ;;  %p1261_p8 = por %p1260_p11, %p1259_p3 }
  0x32   : > { %p1257_p2 = pneg %p1256_p10  ;;  %p1263_p1 = por %p1262_p0, %p1261_p8 }
  0x34   : > { %p1264_p12 = pnand %p1263_p1, %p1257_p2 }
  0x36   : > { %1267 = shalt.err (!%p1264_p12)
}
  0x37   : > { %s1268_s24 = scalar_lea.vmem %s1613_s7, 256  ;;  %s1441_s16 = smov [#allocation4]  }
  0x38   : > { %p1269_p4 = scmp.ne.s32.totalorder %s1613_s7, %s1268_s24  ;;  %s1273_s5 = sshll.u32 %s1441_s16, 4  ;;  %s1274_s5 = int_to_ptr.vmem [resolvable:$false] %s1273_s5 }
  0x39   : > { %s1275_s6 = scalar_lea.vmem %s1274_s5, 512  ;;  %p1276_p7 = scmp.lt.s32.totalorder %s1613_s7, %s1274_s5 }
  0x3a   : > { %p1271_p10 = pnand %p1269_p4, %p1255_p6  ;;  %p1277_p11 = scmp.lt.s32.totalorder %s1275_s6, %s1268_s24 }
  0x3c   : > { %p1272_p9 = pneg %p1271_p10  ;;  %p1278_p3 = por %p1277_p11, %p1276_p7 }
  0x3e   : > { %p1279_p8 = pnand %p1278_p3, %p1272_p9 }
  0x40   : > { %1282 = shalt.err (!%p1279_p8)
}
  0x41   : > { %1141 = dma.hbm_to_vmem [thread:$0]  (!%p1619_p13), %s1611_s3, 256, %s1613_s7, %s294_s4  }
  0x42   : > { %p2001_p2 = scmp.lt.s32.totalorder %s1439_s15, 5  ;;  %p2002_p7 = scmp.ge.s32.totalorder %s1439_s15, 1 }
  0x43   : > { %p41_p12 = scmp.ge.s32.totalorder %s2040_s19, 2  ;;  %p2004_p0 = scmp.gt.s32.totalorder %s1589_s26, 0 }
  0x44   : > { %p1654_p9 = pnand %p2002_p7, %p2001_p2  ;;  %s1083_s2 = sshll.u32 %s2038_s18, 2 }
  0x45   : > { %s2042_s26 = smov (!%p2004_p0, %s1589_s26), 0  ;;  %s2044_s19 = smov (%p41_p12, %s2040_s19), 0 }
  0x46   : > { %2005 = sst [smem:[#allocation17_spill]] %s2044_s19  ;;  %s84_s30 = sadd.s32 1, %s1407_s29 }
  0x47   : > { %s43_s3 = ssub.s32 %s1435_s14, %s2044_s19  ;;  %s1084_s7 = sadd.s32 4294967295, %s1083_s2 }
  0x48   : > { %s2006_s4 = ssub.s32 %s1431_s13, %s2038_s18  ;;  %p77_p13 = scmp.gt.s32.totalorder %s1084_s7, 0 }
  0x49   : > { %s45_s12 = sor.u32 %s2006_s4, %s43_s3  ;;  %p91_p6 = scmp.ne.s32.totalorder %s1407_s29, %s1403_s28 }
  0x4a   : > { %p46_p1 = scmp.eq.s32.totalorder %s45_s12, 0  ;;  %s2046_s7 = smov (!%p77_p13, %s1084_s7), 0 }
  0x4b   : > { %s2007_s22 = sadd.s32 1, %s1419_s10  ;;  %s80_s16 = ssub.s32 %s2042_s26, %s2046_s7 }
  0x4c   : > { %s1677_s24 = scalar_select %p46_p1, %s1419_s10, %s2007_s22  }
  0x4d   : > { %p2008_p4 = scmp.eq.s32.totalorder %s1439_s15, 0  ;;  %s81_s6 = sor.u32 %s80_s16, %s43_s3 }
  0x4e   : > { %p97_p11 = scmp.ne.s32.totalorder %s1403_s28, %s1399_s27  ;;  %p82_p3 = scmp.eq.s32.totalorder %s81_s6, 0 }
  0x4f   : > { %p1681_p10 = por %p91_p6, %p2008_p4  ;;  %s314_s2 = sand.u32 1, %s1407_s29  }
  0x50   : > { %p1690_p8 = por %p97_p11, %p1578_p5  ;;  %s1091_s22 = sshll.u32 %s314_s2, 2 }
  0x51   : > { %s1695_s12 = scalar_select %p82_p3, %s1407_s29, %s84_s30  }
  0x52   : > { %s2010_s4 = scalar_select %p1690_p8, 1, 0 }
  0x53   : > { %s327_s7 = sadd.s32 %s1089_s8, %s2042_s26  ;;  %s318_s27 = scalar_lea.vmem [#allocation7], %s1091_s22 }
  0x54   : > { %s1095_s0 = sshll.u32 %s327_s7, 6  ;;  %s331_s23 = sshll.u32 %s318_s27, 4  ;;  %s1704_s23 = int_to_ptr.vmem [resolvable:$true] %s331_s23 }
  0x55   : > { %s1702_s13 = scalar_lea.hbm %s1964_s1, %s1095_s0  ;;  %p2011_p5 = scmp.lt.s32.totalorder %s1439_s15, 4 }
  0x56   : > { %s315_s8 = scalar_lea.sflag [#allocation8], %s314_s2  ;;  %s1283_s18 = scalar_lea.hbm %s1702_s13, 64 }
  0x57   : > { %p1710_p2 = pnand %p2011_p5, %p1681_p10  ;;  %p1284_p7 = scmp.ne.s32.totalorder %s1702_s13, %s1283_s18 }
  0x58   : > { %s1288_s26 = scalar_lea.hbm %s1964_s1, 1024  ;;  %p1289_p1 = scmp.lt.u32.totalorder %s1702_s13, %s1964_s1 }
  0x59   : > { %p1285_p12 = pneg %p1710_p2  ;;  %p1290_p6 = scmp.lt.u32.totalorder %s1288_s26, %s1283_s18 }
  0x5a   : > { %p1292_p10 = scmp.lt.u32.totalorder %s1283_s18, %s1702_s13 }
  0x5b   : > { %p1286_p0 = pnand %p1285_p12, %p1284_p7  ;;  %p1291_p4 = por %p1290_p6, %p1289_p1 }
  0x5d   : > { %p1287_p13 = pneg %p1286_p0  ;;  %p1293_p11 = por %p1292_p10, %p1291_p4 }
  0x5f   : > { %p1294_p3 = pnand %p1293_p11, %p1287_p13 }
  0x61   : > { %1297 = shalt.err (!%p1294_p3)
}
  0x62   : > { %s1298_s5 = scalar_lea.vmem %s1704_s23, 64  ;;  %s1442_s6 = smov [#allocation7]  }
  0x63   : > { %p1299_p5 = scmp.ne.s32.totalorder %s1704_s23, %s1298_s5  ;;  %s1303_s2 = sshll.u32 %s1442_s6, 4  ;;  %s1304_s2 = int_to_ptr.vmem [resolvable:$false] %s1303_s2 }
  0x64   : > { %s1305_s22 = scalar_lea.vmem %s1304_s2, 128  ;;  %p1306_p8 = scmp.lt.s32.totalorder %s1704_s23, %s1304_s2 }
  0x65   : > { %p1301_p7 = pnand %p1299_p5, %p1285_p12  ;;  %p1307_p1 = scmp.lt.s32.totalorder %s1305_s22, %s1298_s5 }
  0x67   : > { %p1302_p0 = pneg %p1301_p7  ;;  %p1308_p6 = por %p1307_p1, %p1306_p8 }
  0x69   : > { %p1309_p4 = pnand %p1308_p6, %p1302_p0 }
  0x6b   : > { %1312 = shalt.err (!%p1309_p4)
}
  0x6c   : > { %1144 = dma.hbm_to_vmem [thread:$0]  (!%p1710_p2), %s1702_s13, 64, %s1704_s23, %s315_s8  }
  0x6d   : > { %340 = sbr.rel (%p1654_p9) target bundleno = 1011 (0x3f3), region = 52  ;;  %s1742_s7 = sand.u32 (!%p1654_p9), 1, %s1415_s9  }
  0x6e   : > { %s1097_s27 = sshll.u32 (!%p1654_p9), %s1742_s7, 4  ;;  %s343_s18 = scalar_lea.sflag (!%p1654_p9), [#allocation5], %s1742_s7 }
  0x6f   : > { %s346_s0 = scalar_lea.vmem (!%p1654_p9), [#allocation4], %s1097_s27  ;;  %p2013_p8 = scmp.ne.s32.totalorder (!%p1654_p9), %s1996_s25, 0 }
  0x74   : > { %1386 = dma.done.wait (%p2013_p8), %s343_s18, 256  }
  0x75   : > { %1388 = vsyncadd (%p2013_p8), %s343_s18, 4294967040  ;;  %s351_s13 = sand.u32 1, %s1403_s28   ;;  %p2014_p9 = scmp.ne.s32.totalorder %s2010_s4, 0 }
  0x76   : > { %s1098_s23 = sshll.u32 %s351_s13, 2  ;;  %s352_s17 = scalar_lea.sflag [#allocation8], %s351_s13 }
  0x77   : > { %s355_s30 = scalar_lea.vmem [#allocation7], %s1098_s23 }
  0x78   : > { %1390 = dma.done.wait (%p2014_p9), %s352_s17, 64  }
  0x79   : > { %1392 = vsyncadd (%p2014_p9), %s352_s17, 4294967232  ;;  %s1099_s8 = sshll.u32 %s1742_s7, 5  ;;  %v400_v0 = vld [vmem:[%s346_s0] sm:$0xff]  ;;  %v401_v1 = vld [vmem:[%s346_s0 + $0x8] sm:$0xff]  ;;  %p1100_p2 = scmp.ne.s32.totalorder %s1423_s11, 0 }
  0x7a   : > { %v404_v2 = vcombine.high %v400_v0, %v400_v0  ;;  %v405_v3 = vcombine.high %v401_v1, %v401_v1  ;;  %v1756_v4 = vpack.c.bf16 %v400_v0, %v400_v0  ;;  %v1758_v5 = vpack.c.bf16 %v401_v1, %v401_v1  ;;  %s1764_s25 = scalar_lea.vmem [#allocation9], %s1099_s8 }
  0x7b   : > { %415 = sbr.rel (%p1100_p2) target bundleno = 130 (0x82), region = 64  ;;  %v1443_v8 = vmov (!%p1100_p2), 0  }
  0x7c   : > { %v1760_v6 = vpack.c.bf16 %v404_v2, %v404_v2  ;;  %v1762_v7 = vpack.c.bf16 %v405_v3, %v405_v3  ;;  %416 = vst [vmem:[#allocation2] sm:$0x3] (!%p1100_p2), %v1443_v8 }
  0x82 PF: > { %p1101_p12 = scmp.le.s32.totalorder %s1423_s11, 0 }
  0x83   : > { %v421_v9 = vld [vmem:[%s355_s30] sm:$0xf] (!%p1101_p12) }
  0x84   : > { %420 = sbr.rel (%p1101_p12) target bundleno = 139 (0x8b), region = 68  ;;  %v422_v10 = vpack.c.bf16 (!%p1101_p12), %v421_v9, %v421_v9 }
  0x86   : > { %423 = vst [vmem:[#allocation2] sm:$0x3] (!%p1101_p12), %v422_v10 }
  0x8b PF: > { %426 = vst [vmem:[#allocation2 + $0x18] sm:$0x3] %v1758_v5  ;;  %vm684_vm0 = vcmask 31748   ;;  %424 = vst [vmem:[#allocation2 + $0x8] sm:$0x3] %v1756_v4  ;;  %v1444_v11 = vmov 0  }
  0x8c   : > { %425 = vst [vmem:[#allocation2 + $0x10] sm:$0x3] %v1760_v6  ;;  %427 = vst [vmem:[#allocation2 + $0x20] sm:$0x3] %v1762_v7  ;;  %574 = vmatprep.mubr.bf16.mxu0 %v1444_v11  ;;  %615 = vmatprep.mubr.bf16.mxu1 %v1444_v11  ;;  %s1445_s4 = smov 126   ;;  %s1446_s19 = smov 124  }
  0x8d   : > { %431 = vst [vmem:[#allocation2 + $0x18] sm:$0xfc] %v1444_v11  ;;  %680 = vst [vmem:[#allocation3] sm:$0xf0] %v1444_v11  ;;  %1249 = vset.pattern.permute.xlu1 %v1444_v11  ;;  %1250 = vset.pattern.permute.xlu0 %v1444_v11  ;;  %s1447_s26 = smov 8   ;;  %vm453_vm1 = vcmask 1031168  }
  0x8e   : > { %681 = vst [vmem:[#allocation3 + $0x8] sm:$0xf0] %v1444_v11  ;;  %682 = vst [vmem:[#allocation3 + $0x10] sm:$0xf0] %v1444_v11  ;;  %vm468_vm2 = vcmask 1014784   ;;  %vm510_vm3 = vcmask 64512  }
  0x8f   : > { %683 = vst [vmem:[#allocation3 + $0x18] sm:$0xf0] %v1444_v11  ;;  %685 = vst.msk [vmem:[#allocation3 + $0x20] sm:$0xf0] %vm684_vm0, %v1444_v11  ;;  %s2015_s5 = sld [smem:[#allocation20_spill]]  ;;  %s2016_s22 = sld [smem:[#allocation19_spill]] }
  0x90   : > { %428 = vst [vmem:[#allocation2] sm:$0xfc] %v1444_v11  ;;  %429 = vst [vmem:[#allocation2 + $0x8] sm:$0xfc] %v1444_v11  ;;  %vm538_vm4 = vcmask 392192   ;;  %v1448_v54 = vmov 0.0  }
  0x91   : > { %430 = vst [vmem:[#allocation2 + $0x10] sm:$0xfc] %v1444_v11  ;;  %432 = vst [vmem:[#allocation2 + $0x20] sm:$0xfc] %v1444_v11  ;;  %vm1449_vm5 = vmmov 0   ;;  %vm678_vm6 = vcmask 27648  }
  0x94   : > { %v436_v12 = vld [vmem:[#allocation2 + $0x18] sm:$0xff] }
  0x95   : > { %449 = vrot.lane.b32.xlu1 %v436_v12, %s1445_s4  ;;  %v474_v40 = vld [vmem:[%s2015_s5] sm:$0xff] }
  0x96   : > { %v473_v51 = vld [vmem:[%s2016_s22] sm:$0xf] }
  0x97   : > { %v434_v13 = vld [vmem:[#allocation2 + $0x8] sm:$0xff]  ;;  %v433_v14 = vld [vmem:[#allocation2] sm:$0xff] }
  0x98   : > { %445 = vrot.lane.b32.xlu0 %v434_v13, %s1445_s4  ;;  %v435_v15 = vld [vmem:[#allocation2 + $0x10] sm:$0xff]  ;;  %v437_v16 = vld [vmem:[#allocation2 + $0x20] sm:$0xff] }
  0x99   : > { %443 = vrot.lane.b32.xlu1 %v433_v14, %s1445_s4 }
  0x9c   : > { %447 = vrot.lane.b32.xlu0 %v435_v15, %s1445_s4 }
  0x9d   : > { %462 = vrot.lane.b32.xlu1 %v435_v15, %s1446_s19 }
  0xa0   : > { %460 = vrot.lane.b32.xlu0 %v434_v13, %s1446_s19 }
  0xa1   : > { %458 = vrot.lane.b32.xlu1 %v433_v14, %s1446_s19 }
  0xa4   : > { %464 = vrot.lane.b32.xlu0 %v436_v12, %s1446_s19 }
  0xa5   : > { %466 = vrot.lane.b32.xlu1 %v437_v16, %s1446_s19 }
  0xa8   : > { %451 = vrot.lane.b32.xlu0 %v437_v16, %s1445_s4 }
  0xa9   : > { %484 = vrot.lane.b32.xlu1 %v435_v15, %s1447_s26 }
  0xac   : > { %482 = vrot.lane.b32.xlu0 %v434_v13, %s1447_s26 }
  0xb0   : > { %480 = vrot.lane.b32.xlu0 %v433_v14, %s1447_s26 }
 0x107   : > { %v450_v17 = vpop.permute.xlu1 %449 }
 0x10a   : > { %v446_v18 = vpop.permute.xlu0 %445 }
 0x10b   : > { %v444_v19 = vpop.permute.xlu1 %443 }
 0x10c   : > { %v454_v25 = vsel %vm453_vm1, %v444_v19, %v446_v18 }
 0x10e   : > { %v448_v20 = vpop.permute.xlu0 %447 }
 0x10f   : > { %v456_v21 = vsel %vm453_vm1, %v448_v20, %v450_v17  ;;  %v455_v22 = vsel %vm453_vm1, %v446_v18, %v448_v20  ;;  %v463_v23 = vpop.permute.xlu1 %462 }
 0x110   : > { %494 = vrot.lane.b32.xlu0 %v456_v21, %s1447_s26  ;;  %492 = vrot.lane.b32.xlu1 %v455_v22, %s1447_s26 }
 0x112   : > { %v461_v24 = vpop.permute.xlu0 %460 }
 0x113   : > { %v470_v26 = vsel %vm468_vm2, %v461_v24, %v463_v23  ;;  %v459_v27 = vpop.permute.xlu1 %458 }
 0x114   : > { %490 = vrot.lane.b32.xlu1 %v454_v25, %s1447_s26  ;;  %502 = vrot.lane.b32.xlu0 %v470_v26, %s1447_s26  ;;  %v469_v29 = vsel %vm468_vm2, %v459_v27, %v461_v24 }
 0x116   : > { %v465_v28 = vpop.permute.xlu0 %464 }
 0x117   : > { %v471_v30 = vsel %vm468_vm2, %v463_v23, %v465_v28  ;;  %v467_v31 = vpop.permute.xlu1 %466 }
 0x118   : > { %500 = vrot.lane.b32.xlu0 %v469_v29, %s1447_s26  ;;  %504 = vrot.lane.b32.xlu1 %v471_v30, %s1447_s26  ;;  %v472_v38 = vsel %vm468_vm2, %v465_v28, %v467_v31 }
 0x11a   : > { %v452_v32 = vpop.permute.xlu0 %451 }
 0x11b   : > { %v485_v34 = vpop.permute.xlu1 %484  ;;  %v457_v35 = vsel %vm453_vm1, %v450_v17, %v452_v32 }
 0x11c   : > { %488 = vrot.lane.b32.xlu0 %v437_v16, %s1447_s26  ;;  %486 = vrot.lane.b32.xlu1 %v436_v12, %s1447_s26 }
 0x11e   : > { %v483_v33 = vpop.permute.xlu0 %482 }
 0x11f   : > { %v512_v36 = vsel %vm510_vm3, %v483_v33, %v485_v34 }
 0x120   : > { %496 = vrot.lane.b32.xlu1 %v457_v35, %s1447_s26  ;;  %498 = vrot.lane.b32.xlu0 %v452_v32, %s1447_s26 }
 0x121   : > { %542 = vmatprep.subr.bf16.mxu0 %v512_v36 }
 0x122   : > { %v481_v37 = vpop.permute.xlu0 %480 }
 0x123   : > { %v511_v39 = vsel %vm510_vm3, %v481_v37, %v483_v33 }
 0x124   : > { %506 = vrot.lane.b32.xlu1 %v472_v38, %s1447_s26  ;;  %508 = vrot.lane.b32.xlu0 %v467_v31, %s1447_s26 }
 0x125   : > { %543 = vmatpush1.bf16.msra.mxu0 %v511_v39 }
 0x128   : > { %477 = vperm.xlu1 %1249, %v474_v40  }
 0x182   : > { %v493_v41 = vpop.permute.xlu1 %492  ;;  %v495_v42 = vpop.permute.xlu0 %494 }
 0x183   : > { %v516_v43 = vsel %vm510_vm3, %v493_v41, %v495_v42 }
 0x184   : > { %544 = vmatprep.subr.bf16.mxu0 %v516_v43 }
 0x186   : > { %v491_v44 = vpop.permute.xlu1 %490  ;;  %v503_v45 = vpop.permute.xlu0 %502 }
 0x187   : > { %v515_v46 = vsel %vm510_vm3, %v491_v44, %v493_v41 }
 0x188   : > { %545 = vmatpush1.bf16.msra.mxu0 %v515_v46 }
 0x18a   : > { %v505_v47 = vpop.permute.xlu1 %504  ;;  %v501_v48 = vpop.permute.xlu0 %500 }
 0x18b   : > { %v520_v49 = vsel %vm510_vm3, %v503_v45, %v505_v47  ;;  %v519_v50 = vsel %vm510_vm3, %v501_v48, %v503_v45 }
 0x18c   : > { %546 = vmatprep.subr.bf16.mxu0 %v520_v49 }
 0x18d   : > { %547 = vmatpush1.bf16.msra.mxu0 %v519_v50 }
 0x18e   : > { %v487_v52 = vpop.permute.xlu1 %486  ;;  %v489_v53 = vpop.permute.xlu0 %488  ;;  %1122 = vmatprep.subr.bf16.mxu0 %v1448_v54 }
 0x18f   : > { %v514_v55 = vsel %vm510_vm3, %v487_v52, %v489_v53  ;;  %v513_v56 = vsel %vm510_vm3, %v485_v34, %v487_v52  ;;  %v1450_v34 = vmov (!%p1100_p2), 0  }
 0x190   : > { %1102 = vmatmul.mubr.msk.bf16.vlgmr.msra.gmra.mrb[0].mxu0 %vm538_vm4, %v473_v51  ;;  %583 = vmatprep.subr.bf16.mxu1 %v514_v55 }
 0x191   : > { %584 = vmatpush1.bf16.msra.mxu1 %v513_v56  ;;  %1123 = vmatpush3.bf16.msra.mxu0 %v489_v53 }
 0x192   : > { %v497_v57 = vpop.permute.xlu1 %496  ;;  %v499_v58 = vpop.permute.xlu0 %498  ;;  %1124 = vmatprep.subr.bf16.mxu0 %v1448_v54  ;;  %1128 = vmatprep.mubr.msk.bf16.mxu0 %vm1449_vm5, %v1448_v54 }
 0x193   : > { %v518_v59 = vsel %vm510_vm3, %v497_v57, %v499_v58  ;;  %v517_v60 = vsel %vm510_vm3, %v495_v42, %v497_v57 }
 0x194   : > { %585 = vmatprep.subr.bf16.mxu1 %v518_v59 }
 0x195   : > { %586 = vmatpush1.bf16.msra.mxu1 %v517_v60  ;;  %1125 = vmatpush3.bf16.msra.mxu0 %v499_v58 }
 0x196   : > { %v507_v61 = vpop.permute.xlu1 %506  ;;  %v509_v62 = vpop.permute.xlu0 %508  ;;  %1126 = vmatprep.subr.bf16.mxu0 %v1448_v54 }
 0x197   : > { %v522_v63 = vsel %vm510_vm3, %v507_v61, %v509_v62  ;;  %v521_v0 = vsel %vm510_vm3, %v505_v47, %v507_v61 }
 0x198   : > { %587 = vmatprep.subr.bf16.mxu1 %v522_v63 }
 0x199   : > { %588 = vmatpush1.bf16.msra.mxu1 %v521_v0  ;;  %1127 = vmatpush3.bf16.msra.mxu0 %v509_v62 }
 0x19c   : > { %1103 = vmatmul.mubr.msk.bf16.vlgmr.msra.gmra.mrb[0].mxu1 %vm538_vm4, %v473_v51  ;;  %1129 = vmatmul.mubr.msk.bf16.vlgmr.msra.gmra.mrb[4].mxu0 %vm538_vm4, %v473_v51 }
 0x1a7   : > { %v478_v1 = vpop.permute.xlu1 %477 }
 0x263   : > { %v576_v2 = vpop.f32.mrb[0].mxu0 }
 0x264   : > { %v578_v3 = vpop.f32.mrb[1].mxu0  ;;  %v577_v8 = vadd.f32 %v576_v2, %v478_v1 }
 0x265   : > { %v579_v9 = vadd.f32 %v578_v3, %v478_v1  ;;  %v580_v10 = vpop.f32.mrb[2].mxu0 }
 0x266   : > { %v664_v12 = vmax.f32 %v577_v8, 0.0  ;;  %v581_v13 = vpop.f32.mrb[3].mxu0 }
 0x267   : > { %v665_v14 = vmax.f32 %v579_v9, 0.0 }
 0x268   : > { %v669_v15 = vpack.c.bf16 %v664_v12, %v664_v12 }
 0x269   : > { %v670_v16 = vpack.c.bf16 %v665_v14, %v665_v14 }
 0x26a   : > { %674 = vst [vmem:[#allocation3] sm:$0xf] %v669_v15 }
 0x26b   : > { %675 = vst [vmem:[#allocation3 + $0x8] sm:$0xf] %v670_v16  ;;  %689 = vst.msk [vmem:[#allocation3] sm:$0xf] (!%p1100_p2), %vm678_vm6, %v1450_v34 }
 0x26f   : > { %v617_v17 = vpop.f32.mrb[0].mxu1  ;;  %v658_v18 = vpop.f32.mrb[4].mxu0 }
 0x270   : > { %v618_v19 = vadd.f32 %v617_v17, %v478_v1  ;;  %v659_v20 = vadd.f32 %v658_v18, %v478_v1  ;;  %v619_v21 = vpop.f32.mrb[1].mxu1  ;;  %v1130_v22 = vpop.f32.mrb[5].mxu0 }
 0x271   : > { %v620_v23 = vadd.f32 %v619_v21, %v478_v1  ;;  %v621_v24 = vpop.f32.mrb[2].mxu1  ;;  %v661_v25 = vpop.f32.mrb[6].mxu0  ;;  %688 = sbr.rel (%p1100_p2) target bundleno = 632 (0x278), region = 72 }
 0x272   : > { %v666_v26 = vmax.f32 %v618_v19, 0.0  ;;  %v668_v27 = vmax.f32 %v659_v20, 0.0  ;;  %v622_v28 = vpop.f32.mrb[3].mxu1  ;;  %v1131_v29 = vpop.f32.mrb[7].mxu0 }
 0x273   : > { %v667_v30 = vmax.f32 %v620_v23, 0.0 }
 0x274   : > { %v671_v31 = vpack.c.bf16 %v666_v26, %v666_v26  ;;  %v673_v32 = vpack.c.bf16 %v668_v27, %v668_v27 }
 0x275   : > { %v672_v33 = vpack.c.bf16 %v667_v30, %v667_v30 }
 0x276   : > { %676 = vst [vmem:[#allocation3 + $0x10] sm:$0xf] %v671_v31  ;;  %679 = vst.msk [vmem:[#allocation3 + $0x20] sm:$0xf] %vm678_vm6, %v673_v32 }
 0x277   : > { %677 = vst [vmem:[#allocation3 + $0x18] sm:$0xf] %v672_v33 }
 0x278 PF: > { %v691_v35 = vld [vmem:[#allocation3 + $0x8] sm:$0xff]  ;;  %v690_v36 = vld [vmem:[#allocation3] sm:$0xff]  ;;  %778 = vmatprep.mubr.bf16.mxu1 %v1444_v11  ;;  %819 = vmatprep.mubr.bf16.mxu0 %v1444_v11  ;;  %s2017_s0 = sld [smem:[#allocation22_spill]]  ;;  %s2018_s17 = sld [smem:[#allocation24_spill]]  ;;  %vm843_vm7 = vcmask 1041408   ;;  %vm839_vm8 = vcmask 31744  }
 0x279   : > { %702 = vrot.lane.b32.xlu0 %v691_v35, %s1445_s4  ;;  %700 = vrot.lane.b32.xlu1 %v690_v36, %s1445_s4  ;;  %v845_v55 = vsel %vm843_vm7, %v1756_v4, 0  ;;  %s2020_s3 = sld [smem:[#allocation23_spill]]  ;;  %v851_v61 = vsel %vm843_vm7, %v1758_v5, 0  ;;  %s2021_s16 = sld [smem:[#allocation14_spill]] }
 0x27a   : > { %746 = vmatprep.subr.bf16.mxu1 %v691_v35  ;;  %1251 = vset.pattern.permute.xlu0 %v1444_v11  ;;  %s1113_s5 = sshll.u32 %s1423_s11, 2  ;;  %s967_s22 = sshll.u32 %s1764_s25, 4  ;;  %s1900_s22 = int_to_ptr.vmem [resolvable:$true] %s967_s22 }
 0x27b   : > { %747 = vmatpush1.bf16.msra.mxu1 %v690_v36  ;;  %1252 = vset.pattern.permute.xlu1 %v1444_v11  ;;  %s951_s23 = scalar_lea.sflag [#allocation6], %s1742_s7  ;;  %p2023_p10 = scmp.ne.s32.totalorder %s1997_s20, 0 }
 0x27c   : > { %s1451_s30 = smov [#allocation9]  }
 0x27d   : > { %v692_v38 = vld [vmem:[#allocation3 + $0x10] sm:$0xff]  ;;  %720 = vrot.lane.b32.xlu1 %v691_v35, %s1446_s19  ;;  %v694_v39 = vld [vmem:[#allocation3 + $0x20] sm:$0xff]  ;;  %s1317_s8 = sshll.u32 %s1451_s30, 4  ;;  %s1318_s8 = int_to_ptr.vmem [resolvable:$false] %s1317_s8 }
 0x27e   : > { %v693_v37 = vld [vmem:[#allocation3 + $0x18] sm:$0xff]  ;;  %704 = vrot.lane.b32.xlu0 %v692_v38, %s1445_s4  ;;  %p1320_p5 = scmp.lt.s32.totalorder %s1900_s22, %s1318_s8 }
 0x27f   : > { %787 = vmatprep.subr.bf16.mxu0 %v693_v37  ;;  %v737_v40 = vld [vmem:[%s2017_s0] sm:$0xff]  ;;  %s1114_s6 = sshll.u32 %s2021_s16, 3  ;;  %s2022_s0 = sld [smem:[#allocation25_spill]] }
 0x280   : > { %788 = vmatpush1.bf16.msra.mxu0 %v692_v38  ;;  %v833_v41 = vld [vmem:[%s2018_s17] sm:$0xff]  ;;  %s963_s2 = sadd.s32 %s1114_s6, %s1113_s5  ;;  %s1313_s17 = scalar_lea.vmem %s1900_s22, 512 }
 0x281   : > { %718 = vrot.lane.b32.xlu1 %v690_v36, %s1446_s19  ;;  %v832_v60 = vld [vmem:[%s2020_s3] sm:$0xf]  ;;  %s1115_s11 = sshll.u32 %s963_s2, 7  ;;  %p1314_p13 = scmp.ne.s32.totalorder %s1900_s22, %s1313_s17 }
 0x282   : > { %722 = vrot.lane.b32.xlu0 %v692_v38, %s1446_s19 }
 0x283   : > { %p1315_p11 = pnand %p1314_p13, %p2023_p10 }
 0x285   : > { %708 = vrot.lane.b32.xlu1 %v694_v39, %s1445_s4  ;;  %s1898_s13 = scalar_lea.hbm %s2022_s0, %s1115_s11  ;;  %p1316_p3 = pneg %p1315_p11 }
 0x286   : > { %706 = vrot.lane.b32.xlu0 %v693_v37, %s1445_s4  ;;  %s2019_s4 = sld [smem:[#allocation21_spill]] }
 0x289   : > { %726 = vrot.lane.b32.xlu1 %v694_v39, %s1446_s19 }
 0x28a   : > { %724 = vrot.lane.b32.xlu0 %v693_v37, %s1446_s19 }
 0x28c   : > { %v736_v52 = vld [vmem:[%s2019_s4] sm:$0xf]  ;;  %s1319_s4 = scalar_lea.vmem %s1318_s8, 1024 }
 0x28d   : > { %836 = vperm.xlu1 %1252, %v833_v41   ;;  %p1321_p7 = scmp.lt.s32.totalorder %s1319_s4, %s1313_s17 }
 0x28e   : > { %740 = vperm.xlu0 %1251, %v737_v40  }
 0x28f   : > { %p1322_p0 = por %p1321_p7, %p1320_p5 }
 0x291   : > { %p1323_p1 = pnand %p1322_p0, %p1316_p3 }
 0x2eb   : > { %v703_v42 = vpop.permute.xlu0 %702  ;;  %v701_v43 = vpop.permute.xlu1 %700 }
 0x2ec   : > { %v710_v47 = vsel %vm453_vm1, %v701_v43, %v703_v42 }
 0x2ef   : > { %v721_v45 = vpop.permute.xlu1 %720 }
 0x2f0   : > { %v705_v44 = vpop.permute.xlu0 %704 }
 0x2f1   : > { %v711_v46 = vsel %vm453_vm1, %v703_v42, %v705_v44 }
 0x2f2   : > { %748 = vmatprep.subr.bf16.mxu1 %v711_v46 }
 0x2f3   : > { %749 = vmatpush1.bf16.msra.mxu1 %v710_v47  ;;  %v719_v49 = vpop.permute.xlu1 %718 }
 0x2f4   : > { %v723_v48 = vpop.permute.xlu0 %722  ;;  %v728_v50 = vsel %vm468_vm2, %v719_v49, %v721_v45 }
 0x2f5   : > { %v729_v51 = vsel %vm468_vm2, %v721_v45, %v723_v48 }
 0x2f6   : > { %750 = vmatprep.subr.bf16.mxu1 %v729_v51 }
 0x2f7   : > { %751 = vmatpush1.bf16.msra.mxu1 %v728_v50  ;;  %v709_v54 = vpop.permute.xlu1 %708 }
 0x2f8   : > { %v707_v53 = vpop.permute.xlu0 %706  ;;  %1108 = vmatprep.subr.msk.bf16.mxu1 %vm843_vm7, %v1760_v6 }
 0x2f9   : > { %v713_v56 = vsel %vm453_vm1, %v707_v53, %v709_v54  ;;  %v712_v57 = vsel %vm453_vm1, %v705_v44, %v707_v53 }
 0x2fa   : > { %1106 = vmatmul.mubr.msk.bf16.vlgmr.msra.gmra.mrb[4].mxu1 %vm538_vm4, %v736_v52  ;;  %789 = vmatprep.subr.bf16.mxu0 %v713_v56 }
 0x2fb   : > { %790 = vmatpush1.bf16.msra.mxu0 %v712_v57  ;;  %857 = vmatpush1.bf16.msra.mxu1 %v845_v55  ;;  %v727_v59 = vpop.permute.xlu1 %726 }
 0x2fc   : > { %v725_v58 = vpop.permute.xlu0 %724  ;;  %888 = vmatprep.mubr.bf16.mxu1 %v1444_v11  ;;  %1110 = vmatprep.subr.msk.bf16.mxu1 %vm843_vm7, %v1762_v7 }
 0x2fd   : > { %v731_v6 = vsel %vm468_vm2, %v725_v58, %v727_v59  ;;  %v730_v4 = vsel %vm468_vm2, %v723_v48, %v725_v58 }
 0x2fe   : > { %791 = vmatprep.subr.bf16.mxu0 %v731_v6 }
 0x2ff   : > { %792 = vmatpush1.bf16.msra.mxu0 %v730_v4 }
 0x302   : > { %1109 = vmatmul.mubr.msk.bf16.vlgmr.msra.gmra.mrb[8].mxu1 %vm839_vm8, %v832_v60  ;;  %1107 = vmatmul.mubr.msk.bf16.vlgmr.msra.gmra.mrb[8].mxu0 %vm538_vm4, %v736_v52 }
 0x303   : > { %898 = vmatpush1.bf16.msra.mxu1 %v851_v61  ;;  %929 = vmatprep.mubr.bf16.mxu1 %v1444_v11 }
 0x30a   : > { %1111 = vmatmul.mubr.msk.bf16.vlgmr.msra.gmra.mrb[12].mxu1 %vm839_vm8, %v832_v60 }
 0x30c   : > { %v837_v8 = vpop.permute.xlu1 %836 }
 0x30d   : > { %v741_v63 = vpop.permute.xlu0 %740 }
 0x3cd   : > { %v780_v7 = vpop.f32.mrb[4].mxu1 }
 0x3ce   : > { %v782_v62 = vpop.f32.mrb[5].mxu1  ;;  %v781_v2 = vadd.f32 %v780_v7, %v741_v63 }
 0x3cf   : > { %v784_v0 = vpop.f32.mrb[6].mxu1  ;;  %v783_v3 = vadd.f32 %v782_v62, %v741_v63 }
 0x3d0   : > { %v785_v1 = vpop.f32.mrb[7].mxu1  ;;  %v828_v12 = vmax.f32 %v781_v2, 0.0 }
 0x3d1   : > { %v829_v15 = vmax.f32 %v783_v3, 0.0 }
 0x3d5   : > { %v890_v9 = vpop.f32.mrb[8].mxu1  ;;  %v821_v10 = vpop.f32.mrb[8].mxu0 }
 0x3d6   : > { %v891_v5 = vadd.f32 %v890_v9, %v837_v8  ;;  %v892_v13 = vpop.f32.mrb[9].mxu1  ;;  %v823_v14 = vpop.f32.mrb[9].mxu0  ;;  %v822_v20 = vadd.f32 %v821_v10, %v741_v63 }
 0x3d7   : > { %v893_v11 = vadd.f32 %v892_v13, %v837_v8  ;;  %v894_v16 = vpop.f32.mrb[10].mxu1  ;;  %v825_v17 = vpop.f32.mrb[10].mxu0  ;;  %v824_v23 = vadd.f32 %v823_v14, %v741_v63 }
 0x3d8   : > { %v938_v18 = vadd.f32 %v891_v5, %v828_v12  ;;  %v895_v19 = vpop.f32.mrb[11].mxu1  ;;  %v826_v21 = vpop.f32.mrb[11].mxu0  ;;  %v830_v26 = vmax.f32 %v822_v20, 0.0 }
 0x3d9   : > { %v939_v22 = vadd.f32 %v893_v11, %v829_v15  ;;  %v831_v27 = vmax.f32 %v824_v23, 0.0 }
 0x3da   : > { %v942_v24 = vmax.f32 %v938_v18, 0.0 }
 0x3db   : > { %v943_v25 = vmax.f32 %v939_v22, 0.0 }
 0x3dc   : > { %946 = vst [vmem:[%s1764_s25] sm:$0xff] %v942_v24 }
 0x3dd   : > { %947 = vst [vmem:[%s1764_s25 + $0x8] sm:$0xff] %v943_v25  ;;  %v931_v28 = vpop.f32.mrb[12].mxu1 }
 0x3de   : > { %v932_v29 = vadd.f32 %v931_v28, %v837_v8  ;;  %v933_v30 = vpop.f32.mrb[13].mxu1 }
 0x3df   : > { %v934_v31 = vadd.f32 %v933_v30, %v837_v8  ;;  %v935_v32 = vpop.f32.mrb[14].mxu1 }
 0x3e0   : > { %v940_v33 = vadd.f32 %v932_v29, %v830_v26  ;;  %v936_v34 = vpop.f32.mrb[15].mxu1 }
 0x3e1   : > { %v941_v35 = vadd.f32 %v934_v31, %v831_v27 }
 0x3e2   : > { %v944_v36 = vmax.f32 %v940_v33, 0.0 }
 0x3e3   : > { %v945_v37 = vmax.f32 %v941_v35, 0.0 }
 0x3e4   : > { %948 = vst [vmem:[%s1764_s25 + $0x10] sm:$0xff] %v944_v36 }
 0x3e5   : > { %949 = vst [vmem:[%s1764_s25 + $0x18] sm:$0xff] %v945_v37 }
 0x3e6   : > { %1326 = shalt.err (!%p1323_p1)
}
 0x3e7   : > { %s1327_s7 = scalar_lea.hbm %s1898_s13, 512  ;;  %s1331_s26 = scalar_lea.hbm %s2022_s0, 2048 }
 0x3e8   : > { %p1328_p6 = scmp.ne.s32.totalorder %s1898_s13, %s1327_s7  ;;  %p1332_p9 = scmp.lt.u32.totalorder %s1898_s13, %s2022_s0 }
 0x3e9   : > { %p1333_p2 = scmp.lt.u32.totalorder %s1331_s26, %s1327_s7  ;;  %p1335_p13 = scmp.lt.u32.totalorder %s1327_s7, %s1898_s13 }
 0x3ea   : > { %p1329_p4 = pnand %p1328_p6, %p2023_p10 }
 0x3eb   : > { %p1334_p12 = por %p1333_p2, %p1332_p9 }
 0x3ec   : > { %p1330_p8 = pneg %p1329_p4 }
 0x3ed   : > { %p1336_p11 = por %p1335_p13, %p1334_p12 }
 0x3ef   : > { %p1337_p3 = pnand %p1336_p11, %p1330_p8 }
 0x3f1   : > { %1340 = shalt.err (!%p1337_p3)
}
 0x3f2   : > { %1136 = dma.vmem_to_hbm [thread:$0]  (%p2023_p10), %s1900_s22, 512, %s1898_s13, %s951_s23  }
 0x3f3 PF: > { %s2024_s5 = sld [smem:[#allocation13_spill]]  ;;  %p1150_p5 = scmp.ge.s32.totalorder %s1439_s15, 2 }
 0x3f4   : > { %p2025_p7 = scmp.ne.s32.totalorder %s1998_s21, 0 }
 0x3f6   : > { %p1146_p0 = pnand %p1150_p5, %p2025_p7 }
 0x3f9   : > { %s979_s6 = sand.u32 1, %s2024_s5  }
 0x3fa   : > { %s980_s2 = scalar_lea.sflag [#allocation6], %s979_s6 }
 0x3fb   : > { %1394 = dma.done.wait (!%p1146_p0), %s980_s2, 512  }
 0x3fc   : > { %1396 = vsyncadd (!%p1146_p0), %s980_s2, 4294966784  ;;  %s27_s15 = sadd.s32 1, %s1439_s15   ;;  %s2026_s11 = sld [smem:[#allocation15_spill]] }
 0x3fd   : > { %p24_p1 = scmp.ge.s32.totalorder %s27_s15, 6   ;;  %s2027_s13 = sld [smem:[#allocation16_spill]] }
 0x3fe   : > { %s2028_s20 = sld [smem:[#allocation17_spill]]  ;;  %s2029_s27 = smov %s1403_s28 }
 0x3ff   : > { %s2030_s28 = smov %s1407_s29  ;;  %s2031_s29 = smov %s1695_s12 }
 0x400   : > { %s2032_s30 = smov %s1415_s9  ;;  %s2033_s9 = smov %s1419_s10 }
 0x401   : > { %s2034_s10 = smov %s1677_s24  ;;  %s2035_s12 = smov %s1435_s14 }
 0x402   :  { %26 = sbr.rel (!%p24_p1) target bundleno = 20 (0x14), region = 122 }
 0x404   : > { %s2036_s14 = smov %s2028_s20 }
 0x409   :  { %985 = vsyncpa [#allocation5], 1 }
 0x40a   :  { %987 = vsyncpa [#allocation5 + $0x1], 1 }
 0x40b   :  { %988 = vsyncpa [#allocation8], 1 }
 0x40c   :  { %990 = vsyncpa [#allocation8 + $0x1], 1 }
 0x40d   :  { %991 = vsyncpa [#allocation6], 1 }
 0x40e   :  { %993 = vsyncpa [#allocation6 + $0x1], 1 }

// kernel: tpu_custom_call.1
= control target key start
LH: loop header
LB: loop body
LE: loop exit
PB: predicated region body
PF: predicated region fallthrough
CT: control target
= control target key end

     0   :  { %s1963_s0 = inlined_call_operand.hbm [shape: f32[2,4,1024], index: 0, kind: input, shape index: {}]   ;;  %s1964_s1 = inlined_call_operand.hbm [shape: f32[2,4,1024], index: 1, kind: input, shape index: {}]   ;;  %s1965_s2 = inlined_call_operand.vmem [shape: bf16[8,48], index: 2, kind: input, shape index: {}]   ;;  %s1966_s3 = inlined_call_operand.vmem [shape: f32[8,1], index: 3, kind: input, shape index: {}]   ;;  %s1967_s4 = inlined_call_operand.vmem [shape: bf16[8,48], index: 4, kind: input, shape index: {}]   ;;  %s1968_s5 = inlined_call_operand.vmem [shape: f32[8,1], index: 5, kind: input, shape index: {}]   ;;  %s1969_s6 = inlined_call_operand.vmem [shape: bf16[8,4], index: 6, kind: input, shape index: {}]   ;;  %s1970_s7 = inlined_call_operand.vmem [shape: f32[8,1], index: 7, kind: input, shape index: {}]   ;;  %s1971_s8 = inlined_call_operand.hbm [shape: f32[2,8,1024], index: 8, kind: output, shape index: {}]  }
   0x1   :  { %1982 = sst [smem:[#allocation18_spill]] %s1963_s0 }
   0x2   :  { %1983 = sst [smem:[#allocation19_spill]] %s1965_s2 }
   0x3   :  { %1984 = sst [smem:[#allocation20_spill]] %s1966_s3 }
   0x4   :  { %1985 = sst [smem:[#allocation21_spill]] %s1967_s4 }
   0x5   :  { %1986 = sst [smem:[#allocation22_spill]] %s1968_s5 }
   0x6   :  { %1987 = sst [smem:[#allocation23_spill]] %s1969_s6 }
   0x7   :  { %1988 = sst [smem:[#allocation24_spill]] %s1970_s7 }
   0x8   :  { %1989 = sst [smem:[#allocation25_spill]] %s1971_s8 }
   0x9   :  { %13 = vsyncpa [#allocation5], 0 }
   0xa   :  { %15 = vsyncpa [#allocation5 + $0x1], 0 }
   0xb   :  { %16 = vsyncpa [#allocation8], 0 }
   0xc   :  { %18 = vsyncpa [#allocation8 + $0x1], 0 }
   0xd   :  { %19 = vsyncpa [#allocation6], 0 }
   0xe   :  { %21 = vsyncpa [#allocation6 + $0x1], 0  ;;  %s1497_s27 = smov 0   ;;  %s1499_s28 = smov 0  }
   0xf   :  { %s1501_s29 = smov 0   ;;  %s1503_s30 = smov 0  }
  0x10   :  { %s1505_s9 = smov 0   ;;  %s1507_s10 = smov 0  }
  0x11   :  { %s1509_s11 = smov 0   ;;  %s1511_s12 = smov 0  }
  0x12   :  { %s1513_s13 = smov 0   ;;  %s1515_s14 = smov 0  }
  0x13   :  { %s1517_s15 = smov 0  }
  0x14 LB: > { %1990 = sst [smem:[#allocation13_spill]] %s1411_s30  ;;  %s1079_s16 = sadd.s32 4294967295, %s1439_s15   ;;  %s1439_s15 = sphi %s1517_s15, %s27_s15   ;;  %s1435_s14 = sphi %s1515_s14, %s2036_s14   ;;  %s1431_s13 = sphi %s1513_s13, %s2027_s13   ;;  %s1427_s12 = sphi %s1511_s12, %s2035_s12   ;;  %s1423_s11 = sphi %s1509_s11, %s2026_s11   ;;  %s1419_s10 = sphi %s1507_s10, %s2034_s10   ;;  %s1415_s9 = sphi %s1505_s9, %s2033_s9   ;;  %s1411_s30 = sphi %s1503_s30, %s2032_s30   ;;  %s1407_s29 = sphi %s1501_s29, %s2031_s29   ;;  %s1403_s28 = sphi %s1499_s28, %s2030_s28   ;;  %s1399_s27 = sphi %s1497_s27, %s2029_s27  }
  0x15   : > { %1991 = sst [smem:[#allocation14_spill]] %s1427_s12  ;;  %s1080_s17 = sadd.s32 4294967294, %s1439_s15  }
  0x16   : > { %1992 = sst [smem:[#allocation15_spill]] %s1431_s13  ;;  %s36_s18 = sadd.s32 1, %s1431_s13 }
  0x17   : > { %s39_s19 = sadd.s32 1, %s1435_s14  ;;  %p37_p0 = scmp.ge.s32.totalorder %s36_s18, 2 }
  0x18   : > { %p55_p1 = scmp.ne.s32.totalorder %s1419_s10, %s1415_s9  ;;  %p1974_p2 = scmp.eq.s32.totalorder %s1439_s15, 0 }
  0x19   : > { %s2038_s18 = smov (%p37_p0, %s36_s18), 0  ;;  %s2040_s19 = smov (!%p37_p0, %s39_s19), %s1435_s14 }
  0x1a   : > { %1993 = sst [smem:[#allocation16_spill]] %s2038_s18  ;;  %p1572_p3 = por %p1974_p2, %p55_p1 }
  0x1b   : > { %p61_p4 = scmp.ne.s32.totalorder %s1415_s9, %s1411_s30  ;;  %p1578_p5 = scmp.eq.s32.totalorder %s1079_s16, 0 }
  0x1c   : > { %s1081_s24 = sshll.u32 %s1431_s13, 2  ;;  %p249_p6 = scmp.eq.s32.totalorder %s1079_s16, 3 }
  0x1d   : > { %p1585_p7 = por %p1578_p5, %p61_p4  ;;  %s1589_s26 = sadd.s32 4294967295, %s1081_s24 }
  0x1e   : > { %p1595_p9 = por %p249_p6, %p55_p1  ;;  %p255_p10 = scmp.eq.s32.totalorder %s1080_s17, 3 }
  0x1f   : > { %s1996_s25 = scalar_select %p1585_p7, 1, 0 }
  0x20   : > { %s1997_s20 = scalar_select %p1595_p9, 1, 0 }
  0x21   : > { %p1975_p11 = scmp.lt.s32.totalorder %s1439_s15, 4  ;;  %s293_s16 = sand.u32 1, %s1419_s10  }
  0x22   : > { %p1601_p12 = por %p255_p10, %p61_p4  ;;  %s1087_s30 = sshll.u32 %s293_s16, 4 }
  0x23   : > { %s1089_s8 = sshll.u32 %s1435_s14, 3  ;;  %s297_s4 = scalar_lea.vmem [#allocation4], %s1087_s30 }
  0x24   : > { %s1998_s21 = scalar_select %p1601_p12, 1, 0 }
  0x25   : > { %s303_s12 = sadd.s32 %s1089_s8, %s1081_s24  ;;  %s307_s7 = sshll.u32 %s297_s4, 4  ;;  %s1613_s7 = int_to_ptr.vmem [resolvable:$true] %s307_s7 }
  0x26   : > { %s1090_s6 = sshll.u32 %s303_s12, 6  ;;  %s1999_s0 = sld [smem:[#allocation18_spill]] }
  0x27   : > { %p1619_p13 = pnand %p1975_p11, %p1572_p3  ;;  %s294_s4 = scalar_lea.sflag [#allocation5], %s293_s16 }
  0x29   : > { %p1255_p6 = pneg %p1619_p13 }
  0x2c   : > { %s1611_s3 = scalar_lea.hbm %s1999_s0, %s1090_s6  ;;  %s1258_s30 = scalar_lea.hbm %s1999_s0, 1024 }
  0x2d   : > { %s1253_s2 = scalar_lea.hbm %s1611_s3, 256  ;;  %p1259_p3 = scmp.lt.u32.totalorder %s1611_s3, %s1999_s0 }
  0x2e   : > { %p1254_p4 = scmp.ne.s32.totalorder %s1611_s3, %s1253_s2  ;;  %p1260_p11 = scmp.lt.u32.totalorder %s1258_s30, %s1253_s2 }
  0x2f   : > { %p1262_p0 = scmp.lt.u32.totalorder %s1253_s2, %s1611_s3 }
  0x30   : > { %p1256_p10 = pnand %p1255_p6, %p1254_p4  ;;  %p1261_p8 = por %p1260_p11, %p1259_p3 }
  0x32   : > { %p1257_p2 = pneg %p1256_p10  ;;  %p1263_p1 = por %p1262_p0, %p1261_p8 }
  0x34   : > { %p1264_p12 = pnand %p1263_p1, %p1257_p2 }
  0x36   : > { %1267 = shalt.err (!%p1264_p12)
}
  0x37   : > { %s1268_s24 = scalar_lea.vmem %s1613_s7, 256  ;;  %s1441_s16 = smov [#allocation4]  }
  0x38   : > { %p1269_p4 = scmp.ne.s32.totalorder %s1613_s7, %s1268_s24  ;;  %s1273_s5 = sshll.u32 %s1441_s16, 4  ;;  %s1274_s5 = int_to_ptr.vmem [resolvable:$false] %s1273_s5 }
  0x39   : > { %s1275_s6 = scalar_lea.vmem %s1274_s5, 512  ;;  %p1276_p7 = scmp.lt.s32.totalorder %s1613_s7, %s1274_s5 }
  0x3a   : > { %p1271_p10 = pnand %p1269_p4, %p1255_p6  ;;  %p1277_p11 = scmp.lt.s32.totalorder %s1275_s6, %s1268_s24 }
  0x3c   : > { %p1272_p9 = pneg %p1271_p10  ;;  %p1278_p3 = por %p1277_p11, %p1276_p7 }
  0x3e   : > { %p1279_p8 = pnand %p1278_p3, %p1272_p9 }
  0x40   : > { %1282 = shalt.err (!%p1279_p8)
}
  0x41   : > { %1141 = dma.hbm_to_vmem [thread:$0]  (!%p1619_p13), %s1611_s3, 256, %s1613_s7, %s294_s4  }
  0x42   : > { %p2001_p2 = scmp.lt.s32.totalorder %s1439_s15, 5  ;;  %p2002_p7 = scmp.ge.s32.totalorder %s1439_s15, 1 }
  0x43   : > { %p41_p12 = scmp.ge.s32.totalorder %s2040_s19, 2  ;;  %p2004_p0 = scmp.gt.s32.totalorder %s1589_s26, 0 }
  0x44   : > { %p1654_p9 = pnand %p2002_p7, %p2001_p2  ;;  %s1083_s2 = sshll.u32 %s2038_s18, 2 }
  0x45   : > { %s2042_s26 = smov (!%p2004_p0, %s1589_s26), 0  ;;  %s2044_s19 = smov (%p41_p12, %s2040_s19), 0 }
  0x46   : > { %2005 = sst [smem:[#allocation17_spill]] %s2044_s19  ;;  %s84_s30 = sadd.s32 1, %s1407_s29 }
  0x47   : > { %s43_s3 = ssub.s32 %s1435_s14, %s2044_s19  ;;  %s1084_s7 = sadd.s32 4294967295, %s1083_s2 }
  0x48   : > { %s2006_s4 = ssub.s32 %s1431_s13, %s2038_s18  ;;  %p77_p13 = scmp.gt.s32.totalorder %s1084_s7, 0 }
  0x49   : > { %s45_s12 = sor.u32 %s2006_s4, %s43_s3  ;;  %p91_p6 = scmp.ne.s32.totalorder %s1407_s29, %s1403_s28 }
  0x4a   : > { %p46_p1 = scmp.eq.s32.totalorder %s45_s12, 0  ;;  %s2046_s7 = smov (!%p77_p13, %s1084_s7), 0 }
  0x4b   : > { %s2007_s22 = sadd.s32 1, %s1419_s10  ;;  %s80_s16 = ssub.s32 %s2042_s26, %s2046_s7 }
  0x4c   : > { %s1677_s24 = scalar_select %p46_p1, %s1419_s10, %s2007_s22  }
  0x4d   : > { %p2008_p4 = scmp.eq.s32.totalorder %s1439_s15, 0  ;;  %s81_s6 = sor.u32 %s80_s16, %s43_s3 }
  0x4e   : > { %p97_p11 = scmp.ne.s32.totalorder %s1403_s28, %s1399_s27  ;;  %p82_p3 = scmp.eq.s32.totalorder %s81_s6, 0 }
  0x4f   : > { %p1681_p10 = por %p91_p6, %p2008_p4  ;;  %s314_s2 = sand.u32 1, %s1407_s29  }
  0x50   : > { %p1690_p8 = por %p97_p11, %p1578_p5  ;;  %s1091_s22 = sshll.u32 %s314_s2, 2 }
  0x51   : > { %s1695_s12 = scalar_select %p82_p3, %s1407_s29, %s84_s30  }
  0x52   : > { %s2010_s4 = scalar_select %p1690_p8, 1, 0 }
  0x53   : > { %s327_s7 = sadd.s32 %s1089_s8, %s2042_s26  ;;  %s318_s27 = scalar_lea.vmem [#allocation7], %s1091_s22 }
  0x54   : > { %s1095_s0 = sshll.u32 %s327_s7, 6  ;;  %s331_s23 = sshll.u32 %s318_s27, 4  ;;  %s1704_s23 = int_to_ptr.vmem [resolvable:$true] %s331_s23 }
  0x55   : > { %s1702_s13 = scalar_lea.hbm %s1964_s1, %s1095_s0  ;;  %p2011_p5 = scmp.lt.s32.totalorder %s1439_s15, 4 }
  0x56   : > { %s315_s8 = scalar_lea.sflag [#allocation8], %s314_s2  ;;  %s1283_s18 = scalar_lea.hbm %s1702_s13, 64 }
  0x57   : > { %p1710_p2 = pnand %p2011_p5, %p1681_p10  ;;  %p1284_p7 = scmp.ne.s32.totalorder %s1702_s13, %s1283_s18 }
  0x58   : > { %s1288_s26 = scalar_lea.hbm %s1964_s1, 1024  ;;  %p1289_p1 = scmp.lt.u32.totalorder %s1702_s13, %s1964_s1 }
  0x59   : > { %p1285_p12 = pneg %p1710_p2  ;;  %p1290_p6 = scmp.lt.u32.totalorder %s1288_s26, %s1283_s18 }
  0x5a   : > { %p1292_p10 = scmp.lt.u32.totalorder %s1283_s18, %s1702_s13 }
  0x5b   : > { %p1286_p0 = pnand %p1285_p12, %p1284_p7  ;;  %p1291_p4 = por %p1290_p6, %p1289_p1 }
  0x5d   : > { %p1287_p13 = pneg %p1286_p0  ;;  %p1293_p11 = por %p1292_p10, %p1291_p4 }
  0x5f   : > { %p1294_p3 = pnand %p1293_p11, %p1287_p13 }
  0x61   : > { %1297 = shalt.err (!%p1294_p3)
}
  0x62   : > { %s1298_s5 = scalar_lea.vmem %s1704_s23, 64  ;;  %s1442_s6 = smov [#allocation7]  }
  0x63   : > { %p1299_p5 = scmp.ne.s32.totalorder %s1704_s23, %s1298_s5  ;;  %s1303_s2 = sshll.u32 %s1442_s6, 4  ;;  %s1304_s2 = int_to_ptr.vmem [resolvable:$false] %s1303_s2 }
  0x64   : > { %s1305_s22 = scalar_lea.vmem %s1304_s2, 128  ;;  %p1306_p8 = scmp.lt.s32.totalorder %s1704_s23, %s1304_s2 }
  0x65   : > { %p1301_p7 = pnand %p1299_p5, %p1285_p12  ;;  %p1307_p1 = scmp.lt.s32.totalorder %s1305_s22, %s1298_s5 }
  0x67   : > { %p1302_p0 = pneg %p1301_p7  ;;  %p1308_p6 = por %p1307_p1, %p1306_p8 }
  0x69   : > { %p1309_p4 = pnand %p1308_p6, %p1302_p0 }
  0x6b   : > { %1312 = shalt.err (!%p1309_p4)
}
  0x6c   : > { %1144 = dma.hbm_to_vmem [thread:$0]  (!%p1710_p2), %s1702_s13, 64, %s1704_s23, %s315_s8  }
  0x6d   : > { %340 = sbr.rel (%p1654_p9) target bundleno = 1011 (0x3f3), region = 52  ;;  %s1742_s7 = sand.u32 (!%p1654_p9), 1, %s1415_s9  }
  0x6e   : > { %s1097_s27 = sshll.u32 (!%p1654_p9), %s1742_s7, 4  ;;  %s343_s18 = scalar_lea.sflag (!%p1654_p9), [#allocation5], %s1742_s7 }
  0x6f   : > { %s346_s0 = scalar_lea.vmem (!%p1654_p9), [#allocation4], %s1097_s27  ;;  %p2013_p8 = scmp.ne.s32.totalorder (!%p1654_p9), %s1996_s25, 0 }
  0x74   : > { %1386 = dma.done.wait (%p2013_p8), %s343_s18, 256  }
  0x75   : > { %1388 = vsyncadd (%p2013_p8), %s343_s18, 4294967040  ;;  %s351_s13 = sand.u32 1, %s1403_s28   ;;  %p2014_p9 = scmp.ne.s32.totalorder %s2010_s4, 0 }
  0x76   : > { %s1098_s23 = sshll.u32 %s351_s13, 2  ;;  %s352_s17 = scalar_lea.sflag [#allocation8], %s351_s13 }
  0x77   : > { %s355_s30 = scalar_lea.vmem [#allocation7], %s1098_s23 }
  0x78   : > { %1390 = dma.done.wait (%p2014_p9), %s352_s17, 64  }
  0x79   : > { %1392 = vsyncadd (%p2014_p9), %s352_s17, 4294967232  ;;  %s1099_s8 = sshll.u32 %s1742_s7, 5  ;;  %v400_v0 = vld [vmem:[%s346_s0] sm:$0xff]  ;;  %v401_v1 = vld [vmem:[%s346_s0 + $0x8] sm:$0xff]  ;;  %p1100_p2 = scmp.ne.s32.totalorder %s1423_s11, 0 }
  0x7a   : > { %v404_v2 = vcombine.high %v400_v0, %v400_v0  ;;  %v405_v3 = vcombine.high %v401_v1, %v401_v1  ;;  %v1756_v4 = vpack.c.bf16 %v400_v0, %v400_v0  ;;  %v1758_v5 = vpack.c.bf16 %v401_v1, %v401_v1  ;;  %s1764_s25 = scalar_lea.vmem [#allocation9], %s1099_s8 }
  0x7b   : > { %415 = sbr.rel (%p1100_p2) target bundleno = 130 (0x82), region = 64  ;;  %v1443_v8 = vmov (!%p1100_p2), 0  }
  0x7c   : > { %v1760_v6 = vpack.c.bf16 %v404_v2, %v404_v2  ;;  %v1762_v7 = vpack.c.bf16 %v405_v3, %v405_v3  ;;  %416 = vst [vmem:[#allocation2] sm:$0x3] (!%p1100_p2), %v1443_v8 }
  0x82 PF: > { %p1101_p12 = scmp.le.s32.totalorder %s1423_s11, 0 }
  0x83   : > { %v421_v9 = vld [vmem:[%s355_s30] sm:$0xf] (!%p1101_p12) }
  0x84   : > { %420 = sbr.rel (%p1101_p12) target bundleno = 139 (0x8b), region = 68  ;;  %v422_v10 = vpack.c.bf16 (!%p1101_p12), %v421_v9, %v421_v9 }
  0x86   : > { %423 = vst [vmem:[#allocation2] sm:$0x3] (!%p1101_p12), %v422_v10 }
  0x8b PF: > { %426 = vst [vmem:[#allocation2 + $0x18] sm:$0x3] %v1758_v5  ;;  %vm684_vm0 = vcmask 31748   ;;  %424 = vst [vmem:[#allocation2 + $0x8] sm:$0x3] %v1756_v4  ;;  %v1444_v11 = vmov 0  }
  0x8c   : > { %425 = vst [vmem:[#allocation2 + $0x10] sm:$0x3] %v1760_v6  ;;  %427 = vst [vmem:[#allocation2 + $0x20] sm:$0x3] %v1762_v7  ;;  %574 = vmatprep.mubr.bf16.mxu0 %v1444_v11  ;;  %615 = vmatprep.mubr.bf16.mxu1 %v1444_v11  ;;  %s1445_s4 = smov 126   ;;  %s1446_s19 = smov 124  }
  0x8d   : > { %431 = vst [vmem:[#allocation2 + $0x18] sm:$0xfc] %v1444_v11  ;;  %680 = vst [vmem:[#allocation3] sm:$0xf0] %v1444_v11  ;;  %1249 = vset.pattern.permute.xlu1 %v1444_v11  ;;  %1250 = vset.pattern.permute.xlu0 %v1444_v11  ;;  %s1447_s26 = smov 8   ;;  %vm453_vm1 = vcmask 1031168  }
  0x8e   : > { %681 = vst [vmem:[#allocation3 + $0x8] sm:$0xf0] %v1444_v11  ;;  %682 = vst [vmem:[#allocation3 + $0x10] sm:$0xf0] %v1444_v11  ;;  %vm468_vm2 = vcmask 1014784   ;;  %vm510_vm3 = vcmask 64512  }
  0x8f   : > { %683 = vst [vmem:[#allocation3 + $0x18] sm:$0xf0] %v1444_v11  ;;  %685 = vst.msk [vmem:[#allocation3 + $0x20] sm:$0xf0] %vm684_vm0, %v1444_v11  ;;  %s2015_s5 = sld [smem:[#allocation20_spill]]  ;;  %s2016_s22 = sld [smem:[#allocation19_spill]] }
  0x90   : > { %428 = vst [vmem:[#allocation2] sm:$0xfc] %v1444_v11  ;;  %429 = vst [vmem:[#allocation2 + $0x8] sm:$0xfc] %v1444_v11  ;;  %vm538_vm4 = vcmask 392192   ;;  %v1448_v54 = vmov 0.0  }
  0x91   : > { %430 = vst [vmem:[#allocation2 + $0x10] sm:$0xfc] %v1444_v11  ;;  %432 = vst [vmem:[#allocation2 + $0x20] sm:$0xfc] %v1444_v11  ;;  %vm1449_vm5 = vmmov 0   ;;  %vm678_vm6 = vcmask 27648  }
  0x94   : > { %v436_v12 = vld [vmem:[#allocation2 + $0x18] sm:$0xff] }
  0x95   : > { %449 = vrot.lane.b32.xlu1 %v436_v12, %s1445_s4  ;;  %v474_v40 = vld [vmem:[%s2015_s5] sm:$0xff] }
  0x96   : > { %v473_v51 = vld [vmem:[%s2016_s22] sm:$0xf] }
  0x97   : > { %v434_v13 = vld [vmem:[#allocation2 + $0x8] sm:$0xff]  ;;  %v433_v14 = vld [vmem:[#allocation2] sm:$0xff] }
  0x98   : > { %445 = vrot.lane.b32.xlu0 %v434_v13, %s1445_s4  ;;  %v435_v15 = vld [vmem:[#allocation2 + $0x10] sm:$0xff]  ;;  %v437_v16 = vld [vmem:[#allocation2 + $0x20] sm:$0xff] }
  0x99   : > { %443 = vrot.lane.b32.xlu1 %v433_v14, %s1445_s4 }
  0x9c   : > { %447 = vrot.lane.b32.xlu0 %v435_v15, %s1445_s4 }
  0x9d   : > { %462 = vrot.lane.b32.xlu1 %v435_v15, %s1446_s19 }
  0xa0   : > { %460 = vrot.lane.b32.xlu0 %v434_v13, %s1446_s19 }
  0xa1   : > { %458 = vrot.lane.b32.xlu1 %v433_v14, %s1446_s19 }
  0xa4   : > { %464 = vrot.lane.b32.xlu0 %v436_v12, %s1446_s19 }
  0xa5   : > { %466 = vrot.lane.b32.xlu1 %v437_v16, %s1446_s19 }
  0xa8   : > { %451 = vrot.lane.b32.xlu0 %v437_v16, %s1445_s4 }
  0xa9   : > { %484 = vrot.lane.b32.xlu1 %v435_v15, %s1447_s26 }
  0xac   : > { %482 = vrot.lane.b32.xlu0 %v434_v13, %s1447_s26 }
  0xb0   : > { %480 = vrot.lane.b32.xlu0 %v433_v14, %s1447_s26 }
 0x107   : > { %v450_v17 = vpop.permute.xlu1 %449 }
 0x10a   : > { %v446_v18 = vpop.permute.xlu0 %445 }
 0x10b   : > { %v444_v19 = vpop.permute.xlu1 %443 }
 0x10c   : > { %v454_v25 = vsel %vm453_vm1, %v444_v19, %v446_v18 }
 0x10e   : > { %v448_v20 = vpop.permute.xlu0 %447 }
 0x10f   : > { %v456_v21 = vsel %vm453_vm1, %v448_v20, %v450_v17  ;;  %v455_v22 = vsel %vm453_vm1, %v446_v18, %v448_v20  ;;  %v463_v23 = vpop.permute.xlu1 %462 }
 0x110   : > { %494 = vrot.lane.b32.xlu0 %v456_v21, %s1447_s26  ;;  %492 = vrot.lane.b32.xlu1 %v455_v22, %s1447_s26 }
 0x112   : > { %v461_v24 = vpop.permute.xlu0 %460 }
 0x113   : > { %v470_v26 = vsel %vm468_vm2, %v461_v24, %v463_v23  ;;  %v459_v27 = vpop.permute.xlu1 %458 }
 0x114   : > { %490 = vrot.lane.b32.xlu1 %v454_v25, %s1447_s26  ;;  %502 = vrot.lane.b32.xlu0 %v470_v26, %s1447_s26  ;;  %v469_v29 = vsel %vm468_vm2, %v459_v27, %v461_v24 }
 0x116   : > { %v465_v28 = vpop.permute.xlu0 %464 }
 0x117   : > { %v471_v30 = vsel %vm468_vm2, %v463_v23, %v465_v28  ;;  %v467_v31 = vpop.permute.xlu1 %466 }
 0x118   : > { %500 = vrot.lane.b32.xlu0 %v469_v29, %s1447_s26  ;;  %504 = vrot.lane.b32.xlu1 %v471_v30, %s1447_s26  ;;  %v472_v38 = vsel %vm468_vm2, %v465_v28, %v467_v31 }
 0x11a   : > { %v452_v32 = vpop.permute.xlu0 %451 }
 0x11b   : > { %v485_v34 = vpop.permute.xlu1 %484  ;;  %v457_v35 = vsel %vm453_vm1, %v450_v17, %v452_v32 }
 0x11c   : > { %488 = vrot.lane.b32.xlu0 %v437_v16, %s1447_s26  ;;  %486 = vrot.lane.b32.xlu1 %v436_v12, %s1447_s26 }
 0x11e   : > { %v483_v33 = vpop.permute.xlu0 %482 }
 0x11f   : > { %v512_v36 = vsel %vm510_vm3, %v483_v33, %v485_v34 }
 0x120   : > { %496 = vrot.lane.b32.xlu1 %v457_v35, %s1447_s26  ;;  %498 = vrot.lane.b32.xlu0 %v452_v32, %s1447_s26 }
 0x121   : > { %542 = vmatprep.subr.bf16.mxu0 %v512_v36 }
 0x122   : > { %v481_v37 = vpop.permute.xlu0 %480 }
 0x123   : > { %v511_v39 = vsel %vm510_vm3, %v481_v37, %v483_v33 }
 0x124   : > { %506 = vrot.lane.b32.xlu1 %v472_v38, %s1447_s26  ;;  %508 = vrot.lane.b32.xlu0 %v467_v31, %s1447_s26 }
 0x125   : > { %543 = vmatpush1.bf16.msra.mxu0 %v511_v39 }
 0x128   : > { %477 = vperm.xlu1 %1249, %v474_v40  }
 0x182   : > { %v493_v41 = vpop.permute.xlu1 %492  ;;  %v495_v42 = vpop.permute.xlu0 %494 }
 0x183   : > { %v516_v43 = vsel %vm510_vm3, %v493_v41, %v495_v42 }
 0x184   : > { %544 = vmatprep.subr.bf16.mxu0 %v516_v43 }
 0x186   : > { %v491_v44 = vpop.permute.xlu1 %490  ;;  %v503_v45 = vpop.permute.xlu0 %502 }
 0x187   : > { %v515_v46 = vsel %vm510_vm3, %v491_v44, %v493_v41 }
 0x188   : > { %545 = vmatpush1.bf16.msra.mxu0 %v515_v46 }
 0x18a   : > { %v505_v47 = vpop.permute.xlu1 %504  ;;  %v501_v48 = vpop.permute.xlu0 %500 }
 0x18b   : > { %v520_v49 = vsel %vm510_vm3, %v503_v45, %v505_v47  ;;  %v519_v50 = vsel %vm510_vm3, %v501_v48, %v503_v45 }
 0x18c   : > { %546 = vmatprep.subr.bf16.mxu0 %v520_v49 }
 0x18d   : > { %547 = vmatpush1.bf16.msra.mxu0 %v519_v50 }
 0x18e   : > { %v487_v52 = vpop.permute.xlu1 %486  ;;  %v489_v53 = vpop.permute.xlu0 %488  ;;  %1122 = vmatprep.subr.bf16.mxu0 %v1448_v54 }
 0x18f   : > { %v514_v55 = vsel %vm510_vm3, %v487_v52, %v489_v53  ;;  %v513_v56 = vsel %vm510_vm3, %v485_v34, %v487_v52  ;;  %v1450_v34 = vmov (!%p1100_p2), 0  }
 0x190   : > { %1102 = vmatmul.mubr.msk.bf16.vlgmr.msra.gmra.mrb[0].mxu0 %vm538_vm4, %v473_v51  ;;  %583 = vmatprep.subr.bf16.mxu1 %v514_v55 }
 0x191   : > { %584 = vmatpush1.bf16.msra.mxu1 %v513_v56  ;;  %1123 = vmatpush3.bf16.msra.mxu0 %v489_v53 }
 0x192   : > { %v497_v57 = vpop.permute.xlu1 %496  ;;  %v499_v58 = vpop.permute.xlu0 %498  ;;  %1124 = vmatprep.subr.bf16.mxu0 %v1448_v54  ;;  %1128 = vmatprep.mubr.msk.bf16.mxu0 %vm1449_vm5, %v1448_v54 }
 0x193   : > { %v518_v59 = vsel %vm510_vm3, %v497_v57, %v499_v58  ;;  %v517_v60 = vsel %vm510_vm3, %v495_v42, %v497_v57 }
 0x194   : > { %585 = vmatprep.subr.bf16.mxu1 %v518_v59 }
 0x195   : > { %586 = vmatpush1.bf16.msra.mxu1 %v517_v60  ;;  %1125 = vmatpush3.bf16.msra.mxu0 %v499_v58 }
 0x196   : > { %v507_v61 = vpop.permute.xlu1 %506  ;;  %v509_v62 = vpop.permute.xlu0 %508  ;;  %1126 = vmatprep.subr.bf16.mxu0 %v1448_v54 }
 0x197   : > { %v522_v63 = vsel %vm510_vm3, %v507_v61, %v509_v62  ;;  %v521_v0 = vsel %vm510_vm3, %v505_v47, %v507_v61 }
 0x198   : > { %587 = vmatprep.subr.bf16.mxu1 %v522_v63 }
 0x199   : > { %588 = vmatpush1.bf16.msra.mxu1 %v521_v0  ;;  %1127 = vmatpush3.bf16.msra.mxu0 %v509_v62 }
 0x19c   : > { %1103 = vmatmul.mubr.msk.bf16.vlgmr.msra.gmra.mrb[0].mxu1 %vm538_vm4, %v473_v51  ;;  %1129 = vmatmul.mubr.msk.bf16.vlgmr.msra.gmra.mrb[4].mxu0 %vm538_vm4, %v473_v51 }
 0x1a7   : > { %v478_v1 = vpop.permute.xlu1 %477 }
 0x263   : > { %v576_v2 = vpop.f32.mrb[0].mxu0 }
 0x264   : > { %v578_v3 = vpop.f32.mrb[1].mxu0  ;;  %v577_v8 = vadd.f32 %v576_v2, %v478_v1 }
 0x265   : > { %v579_v9 = vadd.f32 %v578_v3, %v478_v1  ;;  %v580_v10 = vpop.f32.mrb[2].mxu0 }
 0x266   : > { %v664_v12 = vmax.f32 %v577_v8, 0.0  ;;  %v581_v13 = vpop.f32.mrb[3].mxu0 }
 0x267   : > { %v665_v14 = vmax.f32 %v579_v9, 0.0 }
 0x268   : > { %v669_v15 = vpack.c.bf16 %v664_v12, %v664_v12 }
 0x269   : > { %v670_v16 = vpack.c.bf16 %v665_v14, %v665_v14 }
 0x26a   : > { %674 = vst [vmem:[#allocation3] sm:$0xf] %v669_v15 }
 0x26b   : > { %675 = vst [vmem:[#allocation3 + $0x8] sm:$0xf] %v670_v16  ;;  %689 = vst.msk [vmem:[#allocation3] sm:$0xf] (!%p1100_p2), %vm678_vm6, %v1450_v34 }
 0x26f   : > { %v617_v17 = vpop.f32.mrb[0].mxu1  ;;  %v658_v18 = vpop.f32.mrb[4].mxu0 }
 0x270   : > { %v618_v19 = vadd.f32 %v617_v17, %v478_v1  ;;  %v659_v20 = vadd.f32 %v658_v18, %v478_v1  ;;  %v619_v21 = vpop.f32.mrb[1].mxu1  ;;  %v1130_v22 = vpop.f32.mrb[5].mxu0 }
 0x271   : > { %v620_v23 = vadd.f32 %v619_v21, %v478_v1  ;;  %v621_v24 = vpop.f32.mrb[2].mxu1  ;;  %v661_v25 = vpop.f32.mrb[6].mxu0  ;;  %688 = sbr.rel (%p1100_p2) target bundleno = 632 (0x278), region = 72 }
 0x272   : > { %v666_v26 = vmax.f32 %v618_v19, 0.0  ;;  %v668_v27 = vmax.f32 %v659_v20, 0.0  ;;  %v622_v28 = vpop.f32.mrb[3].mxu1  ;;  %v1131_v29 = vpop.f32.mrb[7].mxu0 }
 0x273   : > { %v667_v30 = vmax.f32 %v620_v23, 0.0 }
 0x274   : > { %v671_v31 = vpack.c.bf16 %v666_v26, %v666_v26  ;;  %v673_v32 = vpack.c.bf16 %v668_v27, %v668_v27 }
 0x275   : > { %v672_v33 = vpack.c.bf16 %v667_v30, %v667_v30 }
 0x276   : > { %676 = vst [vmem:[#allocation3 + $0x10] sm:$0xf] %v671_v31  ;;  %679 = vst.msk [vmem:[#allocation3 + $0x20] sm:$0xf] %vm678_vm6, %v673_v32 }
 0x277   : > { %677 = vst [vmem:[#allocation3 + $0x18] sm:$0xf] %v672_v33 }
 0x278 PF: > { %v691_v35 = vld [vmem:[#allocation3 + $0x8] sm:$0xff]  ;;  %v690_v36 = vld [vmem:[#allocation3] sm:$0xff]  ;;  %778 = vmatprep.mubr.bf16.mxu1 %v1444_v11  ;;  %819 = vmatprep.mubr.bf16.mxu0 %v1444_v11  ;;  %s2017_s0 = sld [smem:[#allocation22_spill]]  ;;  %s2018_s17 = sld [smem:[#allocation24_spill]]  ;;  %vm843_vm7 = vcmask 1041408   ;;  %vm839_vm8 = vcmask 31744  }
 0x279   : > { %702 = vrot.lane.b32.xlu0 %v691_v35, %s1445_s4  ;;  %700 = vrot.lane.b32.xlu1 %v690_v36, %s1445_s4  ;;  %v845_v55 = vsel %vm843_vm7, %v1756_v4, 0  ;;  %s2020_s3 = sld [smem:[#allocation23_spill]]  ;;  %v851_v61 = vsel %vm843_vm7, %v1758_v5, 0  ;;  %s2021_s16 = sld [smem:[#allocation14_spill]] }
 0x27a   : > { %746 = vmatprep.subr.bf16.mxu1 %v691_v35  ;;  %1251 = vset.pattern.permute.xlu0 %v1444_v11  ;;  %s1113_s5 = sshll.u32 %s1423_s11, 2  ;;  %s967_s22 = sshll.u32 %s1764_s25, 4  ;;  %s1900_s22 = int_to_ptr.vmem [resolvable:$true] %s967_s22 }
 0x27b   : > { %747 = vmatpush1.bf16.msra.mxu1 %v690_v36  ;;  %1252 = vset.pattern.permute.xlu1 %v1444_v11  ;;  %s951_s23 = scalar_lea.sflag [#allocation6], %s1742_s7  ;;  %p2023_p10 = scmp.ne.s32.totalorder %s1997_s20, 0 }
 0x27c   : > { %s1451_s30 = smov [#allocation9]  }
 0x27d   : > { %v692_v38 = vld [vmem:[#allocation3 + $0x10] sm:$0xff]  ;;  %720 = vrot.lane.b32.xlu1 %v691_v35, %s1446_s19  ;;  %v694_v39 = vld [vmem:[#allocation3 + $0x20] sm:$0xff]  ;;  %s1317_s8 = sshll.u32 %s1451_s30, 4  ;;  %s1318_s8 = int_to_ptr.vmem [resolvable:$false] %s1317_s8 }
 0x27e   : > { %v693_v37 = vld [vmem:[#allocation3 + $0x18] sm:$0xff]  ;;  %704 = vrot.lane.b32.xlu0 %v692_v38, %s1445_s4  ;;  %p1320_p5 = scmp.lt.s32.totalorder %s1900_s22, %s1318_s8 }
 0x27f   : > { %787 = vmatprep.subr.bf16.mxu0 %v693_v37  ;;  %v737_v40 = vld [vmem:[%s2017_s0] sm:$0xff]  ;;  %s1114_s6 = sshll.u32 %s2021_s16, 3  ;;  %s2022_s0 = sld [smem:[#allocation25_spill]] }
 0x280   : > { %788 = vmatpush1.bf16.msra.mxu0 %v692_v38  ;;  %v833_v41 = vld [vmem:[%s2018_s17] sm:$0xff]  ;;  %s963_s2 = sadd.s32 %s1114_s6, %s1113_s5  ;;  %s1313_s17 = scalar_lea.vmem %s1900_s22, 512 }
 0x281   : > { %718 = vrot.lane.b32.xlu1 %v690_v36, %s1446_s19  ;;  %v832_v60 = vld [vmem:[%s2020_s3] sm:$0xf]  ;;  %s1115_s11 = sshll.u32 %s963_s2, 7  ;;  %p1314_p13 = scmp.ne.s32.totalorder %s1900_s22, %s1313_s17 }
 0x282   : > { %722 = vrot.lane.b32.xlu0 %v692_v38, %s1446_s19 }
 0x283   : > { %p1315_p11 = pnand %p1314_p13, %p2023_p10 }
 0x285   : > { %708 = vrot.lane.b32.xlu1 %v694_v39, %s1445_s4  ;;  %s1898_s13 = scalar_lea.hbm %s2022_s0, %s1115_s11  ;;  %p1316_p3 = pneg %p1315_p11 }
 0x286   : > { %706 = vrot.lane.b32.xlu0 %v693_v37, %s1445_s4  ;;  %s2019_s4 = sld [smem:[#allocation21_spill]] }
 0x289   : > { %726 = vrot.lane.b32.xlu1 %v694_v39, %s1446_s19 }
 0x28a   : > { %724 = vrot.lane.b32.xlu0 %v693_v37, %s1446_s19 }
 0x28c   : > { %v736_v52 = vld [vmem:[%s2019_s4] sm:$0xf]  ;;  %s1319_s4 = scalar_lea.vmem %s1318_s8, 1024 }
 0x28d   : > { %836 = vperm.xlu1 %1252, %v833_v41   ;;  %p1321_p7 = scmp.lt.s32.totalorder %s1319_s4, %s1313_s17 }
 0x28e   : > { %740 = vperm.xlu0 %1251, %v737_v40  }
 0x28f   : > { %p1322_p0 = por %p1321_p7, %p1320_p5 }
 0x291   : > { %p1323_p1 = pnand %p1322_p0, %p1316_p3 }
 0x2eb   : > { %v703_v42 = vpop.permute.xlu0 %702  ;;  %v701_v43 = vpop.permute.xlu1 %700 }
 0x2ec   : > { %v710_v47 = vsel %vm453_vm1, %v701_v43, %v703_v42 }
 0x2ef   : > { %v721_v45 = vpop.permute.xlu1 %720 }
 0x2f0   : > { %v705_v44 = vpop.permute.xlu0 %704 }
 0x2f1   : > { %v711_v46 = vsel %vm453_vm1, %v703_v42, %v705_v44 }
 0x2f2   : > { %748 = vmatprep.subr.bf16.mxu1 %v711_v46 }
 0x2f3   : > { %749 = vmatpush1.bf16.msra.mxu1 %v710_v47  ;;  %v719_v49 = vpop.permute.xlu1 %718 }
 0x2f4   : > { %v723_v48 = vpop.permute.xlu0 %722  ;;  %v728_v50 = vsel %vm468_vm2, %v719_v49, %v721_v45 }
 0x2f5   : > { %v729_v51 = vsel %vm468_vm2, %v721_v45, %v723_v48 }
 0x2f6   : > { %750 = vmatprep.subr.bf16.mxu1 %v729_v51 }
 0x2f7   : > { %751 = vmatpush1.bf16.msra.mxu1 %v728_v50  ;;  %v709_v54 = vpop.permute.xlu1 %708 }
 0x2f8   : > { %v707_v53 = vpop.permute.xlu0 %706  ;;  %1108 = vmatprep.subr.msk.bf16.mxu1 %vm843_vm7, %v1760_v6 }
 0x2f9   : > { %v713_v56 = vsel %vm453_vm1, %v707_v53, %v709_v54  ;;  %v712_v57 = vsel %vm453_vm1, %v705_v44, %v707_v53 }
 0x2fa   : > { %1106 = vmatmul.mubr.msk.bf16.vlgmr.msra.gmra.mrb[4].mxu1 %vm538_vm4, %v736_v52  ;;  %789 = vmatprep.subr.bf16.mxu0 %v713_v56 }
 0x2fb   : > { %790 = vmatpush1.bf16.msra.mxu0 %v712_v57  ;;  %857 = vmatpush1.bf16.msra.mxu1 %v845_v55  ;;  %v727_v59 = vpop.permute.xlu1 %726 }
 0x2fc   : > { %v725_v58 = vpop.permute.xlu0 %724  ;;  %888 = vmatprep.mubr.bf16.mxu1 %v1444_v11  ;;  %1110 = vmatprep.subr.msk.bf16.mxu1 %vm843_vm7, %v1762_v7 }
 0x2fd   : > { %v731_v6 = vsel %vm468_vm2, %v725_v58, %v727_v59  ;;  %v730_v4 = vsel %vm468_vm2, %v723_v48, %v725_v58 }
 0x2fe   : > { %791 = vmatprep.subr.bf16.mxu0 %v731_v6 }
 0x2ff   : > { %792 = vmatpush1.bf16.msra.mxu0 %v730_v4 }
 0x302   : > { %1109 = vmatmul.mubr.msk.bf16.vlgmr.msra.gmra.mrb[8].mxu1 %vm839_vm8, %v832_v60  ;;  %1107 = vmatmul.mubr.msk.bf16.vlgmr.msra.gmra.mrb[8].mxu0 %vm538_vm4, %v736_v52 }
 0x303   : > { %898 = vmatpush1.bf16.msra.mxu1 %v851_v61  ;;  %929 = vmatprep.mubr.bf16.mxu1 %v1444_v11 }
 0x30a   : > { %1111 = vmatmul.mubr.msk.bf16.vlgmr.msra.gmra.mrb[12].mxu1 %vm839_vm8, %v832_v60 }
 0x30c   : > { %v837_v8 = vpop.permute.xlu1 %836 }
 0x30d   : > { %v741_v63 = vpop.permute.xlu0 %740 }
 0x3cd   : > { %v780_v7 = vpop.f32.mrb[4].mxu1 }
 0x3ce   : > { %v782_v62 = vpop.f32.mrb[5].mxu1  ;;  %v781_v2 = vadd.f32 %v780_v7, %v741_v63 }
 0x3cf   : > { %v784_v0 = vpop.f32.mrb[6].mxu1  ;;  %v783_v3 = vadd.f32 %v782_v62, %v741_v63 }
 0x3d0   : > { %v785_v1 = vpop.f32.mrb[7].mxu1  ;;  %v828_v12 = vmax.f32 %v781_v2, 0.0 }
 0x3d1   : > { %v829_v15 = vmax.f32 %v783_v3, 0.0 }
 0x3d5   : > { %v890_v9 = vpop.f32.mrb[8].mxu1  ;;  %v821_v10 = vpop.f32.mrb[8].mxu0 }
 0x3d6   : > { %v891_v5 = vadd.f32 %v890_v9, %v837_v8  ;;  %v892_v13 = vpop.f32.mrb[9].mxu1  ;;  %v823_v14 = vpop.f32.mrb[9].mxu0  ;;  %v822_v20 = vadd.f32 %v821_v10, %v741_v63 }
 0x3d7   : > { %v893_v11 = vadd.f32 %v892_v13, %v837_v8  ;;  %v894_v16 = vpop.f32.mrb[10].mxu1  ;;  %v825_v17 = vpop.f32.mrb[10].mxu0  ;;  %v824_v23 = vadd.f32 %v823_v14, %v741_v63 }
 0x3d8   : > { %v938_v18 = vadd.f32 %v891_v5, %v828_v12  ;;  %v895_v19 = vpop.f32.mrb[11].mxu1  ;;  %v826_v21 = vpop.f32.mrb[11].mxu0  ;;  %v830_v26 = vmax.f32 %v822_v20, 0.0 }
 0x3d9   : > { %v939_v22 = vadd.f32 %v893_v11, %v829_v15  ;;  %v831_v27 = vmax.f32 %v824_v23, 0.0 }
 0x3da   : > { %v942_v24 = vmax.f32 %v938_v18, 0.0 }
 0x3db   : > { %v943_v25 = vmax.f32 %v939_v22, 0.0 }
 0x3dc   : > { %946 = vst [vmem:[%s1764_s25] sm:$0xff] %v942_v24 }
 0x3dd   : > { %947 = vst [vmem:[%s1764_s25 + $0x8] sm:$0xff] %v943_v25  ;;  %v931_v28 = vpop.f32.mrb[12].mxu1 }
 0x3de   : > { %v932_v29 = vadd.f32 %v931_v28, %v837_v8  ;;  %v933_v30 = vpop.f32.mrb[13].mxu1 }
 0x3df   : > { %v934_v31 = vadd.f32 %v933_v30, %v837_v8  ;;  %v935_v32 = vpop.f32.mrb[14].mxu1 }
 0x3e0   : > { %v940_v33 = vadd.f32 %v932_v29, %v830_v26  ;;  %v936_v34 = vpop.f32.mrb[15].mxu1 }
 0x3e1   : > { %v941_v35 = vadd.f32 %v934_v31, %v831_v27 }
 0x3e2   : > { %v944_v36 = vmax.f32 %v940_v33, 0.0 }
 0x3e3   : > { %v945_v37 = vmax.f32 %v941_v35, 0.0 }
 0x3e4   : > { %948 = vst [vmem:[%s1764_s25 + $0x10] sm:$0xff] %v944_v36 }
 0x3e5   : > { %949 = vst [vmem:[%s1764_s25 + $0x18] sm:$0xff] %v945_v37 }
 0x3e6   : > { %1326 = shalt.err (!%p1323_p1)
}
 0x3e7   : > { %s1327_s7 = scalar_lea.hbm %s1898_s13, 512  ;;  %s1331_s26 = scalar_lea.hbm %s2022_s0, 2048 }
 0x3e8   : > { %p1328_p6 = scmp.ne.s32.totalorder %s1898_s13, %s1327_s7  ;;  %p1332_p9 = scmp.lt.u32.totalorder %s1898_s13, %s2022_s0 }
 0x3e9   : > { %p1333_p2 = scmp.lt.u32.totalorder %s1331_s26, %s1327_s7  ;;  %p1335_p13 = scmp.lt.u32.totalorder %s1327_s7, %s1898_s13 }
 0x3ea   : > { %p1329_p4 = pnand %p1328_p6, %p2023_p10 }
 0x3eb   : > { %p1334_p12 = por %p1333_p2, %p1332_p9 }
 0x3ec   : > { %p1330_p8 = pneg %p1329_p4 }
 0x3ed   : > { %p1336_p11 = por %p1335_p13, %p1334_p12 }
 0x3ef   : > { %p1337_p3 = pnand %p1336_p11, %p1330_p8 }
 0x3f1   : > { %1340 = shalt.err (!%p1337_p3)
}
 0x3f2   : > { %1136 = dma.vmem_to_hbm [thread:$0]  (%p2023_p10), %s1900_s22, 512, %s1898_s13, %s951_s23  }
 0x3f3 PF: > { %s2024_s5 = sld [smem:[#allocation13_spill]]  ;;  %p1150_p5 = scmp.ge.s32.totalorder %s1439_s15, 2 }
 0x3f4   : > { %p2025_p7 = scmp.ne.s32.totalorder %s1998_s21, 0 }
 0x3f6   : > { %p1146_p0 = pnand %p1150_p5, %p2025_p7 }
 0x3f9   : > { %s979_s6 = sand.u32 1, %s2024_s5  }
 0x3fa   : > { %s980_s2 = scalar_lea.sflag [#allocation6], %s979_s6 }
 0x3fb   : > { %1394 = dma.done.wait (!%p1146_p0), %s980_s2, 512  }
 0x3fc   : > { %1396 = vsyncadd (!%p1146_p0), %s980_s2, 4294966784  ;;  %s27_s15 = sadd.s32 1, %s1439_s15   ;;  %s2026_s11 = sld [smem:[#allocation15_spill]] }
 0x3fd   : > { %p24_p1 = scmp.ge.s32.totalorder %s27_s15, 6   ;;  %s2027_s13 = sld [smem:[#allocation16_spill]] }
 0x3fe   : > { %s2028_s20 = sld [smem:[#allocation17_spill]]  ;;  %s2029_s27 = smov %s1403_s28 }
 0x3ff   : > { %s2030_s28 = smov %s1407_s29  ;;  %s2031_s29 = smov %s1695_s12 }
 0x400   : > { %s2032_s30 = smov %s1415_s9  ;;  %s2033_s9 = smov %s1419_s10 }
 0x401   : > { %s2034_s10 = smov %s1677_s24  ;;  %s2035_s12 = smov %s1435_s14 }
 0x402   :  { %26 = sbr.rel (!%p24_p1) target bundleno = 20 (0x14), region = 122 }
 0x404   : > { %s2036_s14 = smov %s2028_s20 }
 0x409   :  { %985 = vsyncpa [#allocation5], 1 }
 0x40a   :  { %987 = vsyncpa [#allocation5 + $0x1], 1 }
 0x40b   :  { %988 = vsyncpa [#allocation8], 1 }
 0x40c   :  { %990 = vsyncpa [#allocation8 + $0x1], 1 }
 0x40d   :  { %991 = vsyncpa [#allocation6], 1 }
 0x40e   :  { %993 = vsyncpa [#allocation6 + $0x1], 1 }

</bundles_post_ra>
